<compile_context>
chip_gen: v7x
topology: tpu7x:2x2x1
jax: 0.10.0
libtpu: 0.0.40
codegen_flags: <defaults>
</compile_context>

<pallas_src>
import functools

import jax
import jax.numpy as jnp
import numpy as np
from jax.experimental import pallas as pl
from jax.experimental.pallas import tpu as pltpu


# ---------------------------------------------------------------------------
# Fused bidirectional-GRU + FC kernel (single invocation, no grid)
# ---------------------------------------------------------------------------
def _fused_bigru_kernel(x_ref,                       # (T*Bp, E)  embedded seq, time-major
                        wihf_ref, whhf_ref, bif_ref, bhnf_ref,   # fwd dir
                        wihb_ref, whhb_ref, bib_ref, bhnb_ref,   # bwd dir
                        wfc_ref, bfc_ref,            # final linear
                        out_ref, hid_ref,            # outputs (Bp,O), (Bp,2H)
                        gif_s, gib_s,                # VMEM scratch (T*Bp, 3H) each
                        *, T, Bp, H, unroll):
    x = x_ref[...]                                   # (T*Bp, E)

    # Hoisted input projections: one MXU matmul per direction for the whole
    # sequence. Gate order along the last dim is [r, z, n]; the bias already
    # contains b_ih (+ b_hh for r,z).
    gif_s[...] = (jnp.dot(x, wihf_ref[...], preferred_element_type=jnp.float32)
                  + bif_ref[...])
    gib_s[...] = (jnp.dot(x, wihb_ref[...], preferred_element_type=jnp.float32)
                  + bib_ref[...])

    # Weights / biases hoisted out of the loop (avoid re-broadcast per iter).
    whh_f = whhf_ref[...]                            # (H, 3H)
    whh_b = whhb_ref[...]
    bhn_f = jnp.broadcast_to(bhnf_ref[...], (Bp, H))
    bhn_b = jnp.broadcast_to(bhnb_ref[...], (Bp, H))

    def cell(gi, h, whh, bhn):
        # gi: (Bp, 3H) pre-computed input projection (+ combined biases)
        gh = jnp.dot(h, whh, preferred_element_type=jnp.float32)   # (Bp, 3H)
        r = jax.nn.sigmoid(gi[:, :H] + gh[:, :H])
        z = jax.nn.sigmoid(gi[:, H:2 * H] + gh[:, H:2 * H])
        n = jnp.tanh(gi[:, 2 * H:] + r * (gh[:, 2 * H:] + bhn))
        return (1.0 - z) * n + z * h

    def step(t, carry):
        h_f, h_b = carry
        off_f = pl.multiple_of(t * Bp, 8)            # Bp is a multiple of 8
        off_b = pl.multiple_of((T - 1 - t) * Bp, 8)
        gi_f = gif_s[pl.ds(off_f, Bp), :]            # (Bp, 3H)
        gi_b = gib_s[pl.ds(off_b, Bp), :]
        return (cell(gi_f, h_f, whh_f, bhn_f),
                cell(gi_b, h_b, whh_b, bhn_b))

    h0 = jnp.zeros((Bp, H), jnp.float32)
    h_f, h_b = jax.lax.fori_loop(0, T, step, (h0, h0), unroll=unroll)

    # Epilogue: concat final hiddens + final linear, all in VMEM.
    hidden = jnp.concatenate([h_f, h_b], axis=-1)    # (Bp, 2H)
    hid_ref[...] = hidden
    out_ref[...] = (jnp.dot(hidden, wfc_ref[...], preferred_element_type=jnp.float32)
                    + bfc_ref[...])


def _fused_bigru_call(x_flat, fused, *, T, Bp, H, O, unroll):
    kernel = functools.partial(_fused_bigru_kernel, T=T, Bp=Bp, H=H, unroll=unroll)
    out, hid = pl.pallas_call(
        kernel,
        out_shape=(jax.ShapeDtypeStruct((Bp, O), jnp.float32),
                   jax.ShapeDtypeStruct((Bp, 2 * H), jnp.float32)),
        scratch_shapes=[pltpu.VMEM((T * Bp, 3 * H), jnp.float32),
                        pltpu.VMEM((T * Bp, 3 * H), jnp.float32)],
    )(x_flat,
      fused["wih_f"], fused["whh_f"], fused["bi_f"], fused["bhn_f"],
      fused["wih_b"], fused["whh_b"], fused["bi_b"], fused["bhn_b"],
      fused["w_fc"], fused["b_fc"])
    return out, hid


# ---------------------------------------------------------------------------
# Parameter fusion (gate-stacked [r,z,n] -> (E,3H)/(H,3H) + combined biases)
# ---------------------------------------------------------------------------
def _fuse_direction(wih, whh, bih, bhh):
    # wih: (3, E, H), whh: (3, H, H), biases: (3, 1, H); gate order [r, z, n].
    wih_c = jnp.concatenate([wih[0], wih[1], wih[2]], axis=-1)          # (E, 3H)
    whh_c = jnp.concatenate([whh[0], whh[1], whh[2]], axis=-1)          # (H, 3H)
    # r,z gates: b_ih + b_hh can be merged; n gate: only b_ih here, b_hh_n
    # stays inside r * (.) per the PyTorch GRU equations.
    bi = jnp.concatenate([bih[0] + bhh[0], bih[1] + bhh[1], bih[2]], axis=-1)  # (1, 3H)
    bhn = bhh[2]                                                        # (1, H)
    return wih_c, whh_c, bi, bhn


# ---------------------------------------------------------------------------
# Full model forward
# ---------------------------------------------------------------------------
@jax.jit
def gru_model_forward(text, params):
    B, T = text.shape
    E = params["embedding"].shape[1]
    H = params["whh_f"].shape[-1]
    O = params["w_fc"].shape[-1]
    Bp = ((B + 7) // 8) * 8                           # pad batch to sublane multiple

    # Embedding lookup directly into time-major (T, B, E) order; dropout is
    # identity in eval mode.
    emb_t = jnp.take(params["embedding"], text.T, axis=0)               # (T, B, E)
    if Bp != B:
        emb_t = jnp.pad(emb_t, ((0, 0), (0, Bp - B), (0, 0)))
    x_flat = emb_t.reshape(T * Bp, E)                                   # contiguous view

    wih_f, whh_f, bi_f, bhn_f = _fuse_direction(params["wih_f"], params["whh_f"],
                                                params["bih_f"], params["bhh_f"])
    wih_b, whh_b, bi_b, bhn_b = _fuse_direction(params["wih_b"], params["whh_b"],
                                                params["bih_b"], params["bhh_b"])
    fused = dict(wih_f=wih_f, whh_f=whh_f, bi_f=bi_f, bhn_f=bhn_f,
                 wih_b=wih_b, whh_b=whh_b, bi_b=bi_b, bhn_b=bhn_b,
                 w_fc=params["w_fc"], b_fc=params["b_fc"].reshape(1, O))

    out_p, hid_p = _fused_bigru_call(x_flat, fused, T=T, Bp=Bp, H=H, O=O,
                                     unroll=bool(T <= 16))
    # torch: cat((hidden[-2], hidden[-1]), dim=1) == cat(fwd_final, bwd_final)
    return out_p[:B], hid_p[:B]


# ---------------------------------------------------------------------------
# Pure-JAX reference (for correctness check)
# ---------------------------------------------------------------------------
def _gru_dir_ref(x_tbe, wih, whh, bih, bhh, reverse):
    T, B, _ = x_tbe.shape
    H = whh.shape[-1]
    h = jnp.zeros((B, H), jnp.float32)
    order = range(T - 1, -1, -1) if reverse else range(T)
    for t in order:
        x = x_tbe[t]
        gi = [x @ wih[g] + bih[g, 0] for g in range(3)]
        gh = [h @ whh[g] + bhh[g, 0] for g in range(3)]
        r = jax.nn.sigmoid(gi[0] + gh[0])
        z = jax.nn.sigmoid(gi[1] + gh[1])
        n = jnp.tanh(gi[2] + r * gh[2])
        h = (1.0 - z) * n + z * h
    return h


def reference_forward(text, params):
    emb = jnp.take(params["embedding"], text, axis=0)
    x_tbe = jnp.transpose(emb, (1, 0, 2))
    h_f = _gru_dir_ref(x_tbe, params["wih_f"], params["whh_f"],
                       params["bih_f"], params["bhh_f"], reverse=False)
    h_b = _gru_dir_ref(x_tbe, params["wih_b"], params["whh_b"],
                       params["bih_b"], params["bhh_b"], reverse=True)
    hidden = jnp.concatenate([h_f, h_b], axis=1)
    output = hidden @ params["w_fc"] + params["b_fc"]
    return output, hidden


# ---------------------------------------------------------------------------
# Parameter init (deterministic, PyTorch-style uniform(-1/sqrt(H), 1/sqrt(H)))
# ---------------------------------------------------------------------------
def init_params(key, vocab, E, H, O):
    ks = jax.random.split(key, 12)
    bound = 1.0 / np.sqrt(H)
    u = lambda k, shape: jax.random.uniform(k, shape, jnp.float32, -bound, bound)
    return {
        "embedding": jax.random.normal(ks[0], (vocab, E), jnp.float32),
        "wih_f": u(ks[1], (3, E, H)), "whh_f": u(ks[2], (3, H, H)),
        "bih_f": u(ks[3], (3, 1, H)), "bhh_f": u(ks[4], (3, 1, H)),
        "wih_b": u(ks[5], (3, E, H)), "whh_b": u(ks[6], (3, H, H)),
        "bih_b": u(ks[7], (3, 1, H)), "bhh_b": u(ks[8], (3, 1, H)),
        "w_fc": u(ks[9], (2 * H, O)),
        "b_fc": u(ks[10], (O,)),
    }


if __name__ == "__main__":
    B, T = 2, 8          # batch, sequence length
    VOCAB, E, H, O = 50, 16, 32, 4

    key = jax.random.PRNGKey(0)
    k_par, k_txt = jax.random.split(key)
    params = init_params(k_par, VOCAB, E, H, O)
    text = jax.random.randint(k_txt, (B, T), 0, VOCAB, dtype=jnp.int32)

    out, hidden = gru_model_forward(text, params)
    out, hidden = jax.block_until_ready((out, hidden))

    ref_out, ref_hidden = reference_forward(text, params)
    assert out.shape == (B, O) and hidden.shape == (B, 2 * H)
    np.testing.assert_allclose(np.asarray(out), np.asarray(ref_out),
                               rtol=1e-5, atol=1e-5)
    np.testing.assert_allclose(np.asarray(hidden), np.asarray(ref_hidden),
                               rtol=1e-5, atol=1e-5)
    print("KERNEL_OK")
</pallas_src>

<mosaic_0001>
module attributes {stable_mosaic.version = 11 : i64} {
  func.func @_fused_bigru_kernel(%arg0: memref<64x16xf32, #tpu.memory_space<vmem>>, %arg1: memref<16x96xf32, #tpu.memory_space<vmem>>, %arg2: memref<32x96xf32, #tpu.memory_space<vmem>>, %arg3: memref<1x96xf32, #tpu.memory_space<vmem>>, %arg4: memref<1x32xf32, #tpu.memory_space<vmem>>, %arg5: memref<16x96xf32, #tpu.memory_space<vmem>>, %arg6: memref<32x96xf32, #tpu.memory_space<vmem>>, %arg7: memref<1x96xf32, #tpu.memory_space<vmem>>, %arg8: memref<1x32xf32, #tpu.memory_space<vmem>>, %arg9: memref<64x4xf32, #tpu.memory_space<vmem>>, %arg10: memref<1x4xf32, #tpu.memory_space<vmem>>, %arg11: memref<8x4xf32, #tpu.memory_space<vmem>>, %arg12: memref<8x64xf32, #tpu.memory_space<vmem>>, %arg13: memref<64x96xf32, #tpu.memory_space<vmem>>, %arg14: memref<64x96xf32, #tpu.memory_space<vmem>>) attributes {dimension_semantics = [], scalar_prefetch = 0 : i64, scratch_operands = 2 : i64, tpu.core_type = #tpu.core_type<tc>} {
    %c0 = arith.constant 0 : index
    %c0_0 = arith.constant 0 : index
    %0 = vector.load %arg0[%c0, %c0_0] : memref<64x16xf32, #tpu.memory_space<vmem>>, vector<64x16xf32>
    %c0_1 = arith.constant 0 : index
    %c0_2 = arith.constant 0 : index
    %1 = vector.load %arg1[%c0_1, %c0_2] : memref<16x96xf32, #tpu.memory_space<vmem>>, vector<16x96xf32>
    %cst = arith.constant dense<0.000000e+00> : vector<64x96xf32>
    %2 = tpu.matmul %0, %1, %cst {dimension_numbers = #tpu.dot_dimension_numbers<[1], [0], [0], [1], [0, 0, 1, 1], [], []>} : vector<64x16xf32>, vector<16x96xf32>, vector<64x96xf32> -> vector<64x96xf32>
    %c0_3 = arith.constant 0 : index
    %c0_4 = arith.constant 0 : index
    %3 = vector.load %arg3[%c0_3, %c0_4] : memref<1x96xf32, #tpu.memory_space<vmem>>, vector<1x96xf32>
    %4 = vector.broadcast %3 : vector<1x96xf32> to vector<64x96xf32>
    %5 = arith.addf %2, %4 : vector<64x96xf32>
    %c0_5 = arith.constant 0 : index
    %c0_6 = arith.constant 0 : index
    %6 = vector.load %arg13[%c0_5, %c0_6] : memref<64x96xf32, #tpu.memory_space<vmem>>, vector<64x96xf32>
    tpu.vector_store %arg13[%c0_5, %c0_6], %5 {strides = array<i32>} : memref<64x96xf32, #tpu.memory_space<vmem>>, vector<64x96xf32>,
    %c0_7 = arith.constant 0 : index
    %c0_8 = arith.constant 0 : index
    %7 = vector.load %arg5[%c0_7, %c0_8] : memref<16x96xf32, #tpu.memory_space<vmem>>, vector<16x96xf32>
    %cst_9 = arith.constant dense<0.000000e+00> : vector<64x96xf32>
    %8 = tpu.matmul %0, %7, %cst_9 {dimension_numbers = #tpu.dot_dimension_numbers<[1], [0], [0], [1], [0, 0, 1, 1], [], []>} : vector<64x16xf32>, vector<16x96xf32>, vector<64x96xf32> -> vector<64x96xf32>
    %c0_10 = arith.constant 0 : index
    %c0_11 = arith.constant 0 : index
    %9 = vector.load %arg7[%c0_10, %c0_11] : memref<1x96xf32, #tpu.memory_space<vmem>>, vector<1x96xf32>
    %10 = vector.broadcast %9 : vector<1x96xf32> to vector<64x96xf32>
    %11 = arith.addf %8, %10 : vector<64x96xf32>
    %c0_12 = arith.constant 0 : index
    %c0_13 = arith.constant 0 : index
    %12 = vector.load %arg14[%c0_12, %c0_13] : memref<64x96xf32, #tpu.memory_space<vmem>>, vector<64x96xf32>
    tpu.vector_store %arg14[%c0_12, %c0_13], %11 {strides = array<i32>} : memref<64x96xf32, #tpu.memory_space<vmem>>, vector<64x96xf32>,
    %c0_14 = arith.constant 0 : index
    %c0_15 = arith.constant 0 : index
    %13 = vector.load %arg2[%c0_14, %c0_15] : memref<32x96xf32, #tpu.memory_space<vmem>>, vector<32x96xf32>
    %c0_16 = arith.constant 0 : index
    %c0_17 = arith.constant 0 : index
    %14 = vector.load %arg6[%c0_16, %c0_17] : memref<32x96xf32, #tpu.memory_space<vmem>>, vector<32x96xf32>
    %c0_18 = arith.constant 0 : index
    %c0_19 = arith.constant 0 : index
    %15 = vector.load %arg4[%c0_18, %c0_19] : memref<1x32xf32, #tpu.memory_space<vmem>>, vector<1x32xf32>
    %16 = vector.shape_cast %15 : vector<1x32xf32> to vector<1x32xf32>
    %17 = vector.broadcast %16 : vector<1x32xf32> to vector<8x32xf32>
    %c0_20 = arith.constant 0 : index
    %c0_21 = arith.constant 0 : index
    %18 = vector.load %arg8[%c0_20, %c0_21] : memref<1x32xf32, #tpu.memory_space<vmem>>, vector<1x32xf32>
    %19 = vector.shape_cast %18 : vector<1x32xf32> to vector<1x32xf32>
    %20 = vector.broadcast %19 : vector<1x32xf32> to vector<8x32xf32>
    %cst_22 = arith.constant 0.000000e+00 : f32
    %21 = vector.broadcast %cst_22 : f32 to vector<8x32xf32>
    %c0_i32 = arith.constant 0 : i32
    %c8_i32 = arith.constant 8 : i32
    %22 = arith.muli %c0_i32, %c8_i32 : i32
    %23 = tpu.assume_multiple %22, 8 : i32
    %c7_i32 = arith.constant 7 : i32
    %24 = arith.subi %c7_i32, %c0_i32 : i32
    %c8_i32_23 = arith.constant 8 : i32
    %25 = arith.muli %24, %c8_i32_23 : i32
    %26 = tpu.assume_multiple %25, 8 : i32
    %27 = arith.index_cast %23 : i32 to index
    %c0_24 = arith.constant 0 : index
    %28 = vector.load %arg13[%27, %c0_24] : memref<64x96xf32, #tpu.memory_space<vmem>>, vector<8x96xf32>
    %29 = arith.index_cast %26 : i32 to index
    %c0_25 = arith.constant 0 : index
    %30 = vector.load %arg14[%29, %c0_25] : memref<64x96xf32, #tpu.memory_space<vmem>>, vector<8x96xf32>
    %cst_26 = arith.constant dense<0.000000e+00> : vector<8x96xf32>
    %31 = tpu.matmul %21, %13, %cst_26 {dimension_numbers = #tpu.dot_dimension_numbers<[1], [0], [0], [1], [0, 0, 1, 1], [], []>} : vector<8x32xf32>, vector<32x96xf32>, vector<8x96xf32> -> vector<8x96xf32>
    %32 = vector.extract_strided_slice %28 {offsets = [0, 0], sizes = [8, 32], strides = [1, 1]} : vector<8x96xf32> to vector<8x32xf32>
    %33 = vector.extract_strided_slice %31 {offsets = [0, 0], sizes = [8, 32], strides = [1, 1]} : vector<8x96xf32> to vector<8x32xf32>
    %34 = arith.addf %32, %33 : vector<8x32xf32>
    %35 = arith.negf %34 : vector<8x32xf32>
    %36 = math.exp %35 : vector<8x32xf32>
    %cst_27 = arith.constant 1.000000e+00 : f32
    %37 = vector.broadcast %cst_27 : f32 to vector<8x32xf32>
    %38 = arith.addf %37, %36 : vector<8x32xf32>
    %39 = arith.divf %37, %38 : vector<8x32xf32>
    %40 = vector.extract_strided_slice %28 {offsets = [0, 32], sizes = [8, 32], strides = [1, 1]} : vector<8x96xf32> to vector<8x32xf32>
    %41 = vector.extract_strided_slice %31 {offsets = [0, 32], sizes = [8, 32], strides = [1, 1]} : vector<8x96xf32> to vector<8x32xf32>
    %42 = arith.addf %40, %41 : vector<8x32xf32>
    %43 = arith.negf %42 : vector<8x32xf32>
    %44 = math.exp %43 : vector<8x32xf32>
    %cst_28 = arith.constant 1.000000e+00 : f32
    %45 = vector.broadcast %cst_28 : f32 to vector<8x32xf32>
    %46 = arith.addf %45, %44 : vector<8x32xf32>
    %47 = arith.divf %45, %46 : vector<8x32xf32>
    %48 = vector.extract_strided_slice %28 {offsets = [0, 64], sizes = [8, 32], strides = [1, 1]} : vector<8x96xf32> to vector<8x32xf32>
    %49 = vector.extract_strided_slice %31 {offsets = [0, 64], sizes = [8, 32], strides = [1, 1]} : vector<8x96xf32> to vector<8x32xf32>
    %50 = arith.addf %49, %17 : vector<8x32xf32>
    %51 = arith.mulf %39, %50 : vector<8x32xf32>
    %52 = arith.addf %48, %51 : vector<8x32xf32>
    %53 = math.tanh %52 : vector<8x32xf32>
    %cst_29 = arith.constant 1.000000e+00 : f32
    %54 = vector.broadcast %cst_29 : f32 to vector<8x32xf32>
    %55 = arith.subf %54, %47 : vector<8x32xf32>
    %56 = arith.mulf %55, %53 : vector<8x32xf32>
    %57 = arith.mulf %47, %21 : vector<8x32xf32>
    %58 = arith.addf %56, %57 : vector<8x32xf32>
    %cst_30 = arith.constant dense<0.000000e+00> : vector<8x96xf32>
    %59 = tpu.matmul %21, %14, %cst_30 {dimension_numbers = #tpu.dot_dimension_numbers<[1], [0], [0], [1], [0, 0, 1, 1], [], []>} : vector<8x32xf32>, vector<32x96xf32>, vector<8x96xf32> -> vector<8x96xf32>
    %60 = vector.extract_strided_slice %30 {offsets = [0, 0], sizes = [8, 32], strides = [1, 1]} : vector<8x96xf32> to vector<8x32xf32>
    %61 = vector.extract_strided_slice %59 {offsets = [0, 0], sizes = [8, 32], strides = [1, 1]} : vector<8x96xf32> to vector<8x32xf32>
    %62 = arith.addf %60, %61 : vector<8x32xf32>
    %63 = arith.negf %62 : vector<8x32xf32>
    %64 = math.exp %63 : vector<8x32xf32>
    %cst_31 = arith.constant 1.000000e+00 : f32
    %65 = vector.broadcast %cst_31 : f32 to vector<8x32xf32>
    %66 = arith.addf %65, %64 : vector<8x32xf32>
    %67 = arith.divf %65, %66 : vector<8x32xf32>
    %68 = vector.extract_strided_slice %30 {offsets = [0, 32], sizes = [8, 32], strides = [1, 1]} : vector<8x96xf32> to vector<8x32xf32>
    %69 = vector.extract_strided_slice %59 {offsets = [0, 32], sizes = [8, 32], strides = [1, 1]} : vector<8x96xf32> to vector<8x32xf32>
    %70 = arith.addf %68, %69 : vector<8x32xf32>
    %71 = arith.negf %70 : vector<8x32xf32>
    %72 = math.exp %71 : vector<8x32xf32>
    %cst_32 = arith.constant 1.000000e+00 : f32
    %73 = vector.broadcast %cst_32 : f32 to vector<8x32xf32>
    %74 = arith.addf %73, %72 : vector<8x32xf32>
    %75 = arith.divf %73, %74 : vector<8x32xf32>
    %76 = vector.extract_strided_slice %30 {offsets = [0, 64], sizes = [8, 32], strides = [1, 1]} : vector<8x96xf32> to vector<8x32xf32>
    %77 = vector.extract_strided_slice %59 {offsets = [0, 64], sizes = [8, 32], strides = [1, 1]} : vector<8x96xf32> to vector<8x32xf32>
    %78 = arith.addf %77, %20 : vector<8x32xf32>
    %79 = arith.mulf %67, %78 : vector<8x32xf32>
    %80 = arith.addf %76, %79 : vector<8x32xf32>
    %81 = math.tanh %80 : vector<8x32xf32>
    %cst_33 = arith.constant 1.000000e+00 : f32
    %82 = vector.broadcast %cst_33 : f32 to vector<8x32xf32>
    %83 = arith.subf %82, %75 : vector<8x32xf32>
    %84 = arith.mulf %83, %81 : vector<8x32xf32>
    %85 = arith.mulf %75, %21 : vector<8x32xf32>
    %86 = arith.addf %84, %85 : vector<8x32xf32>
    %c1_i32 = arith.constant 1 : i32
    %c8_i32_34 = arith.constant 8 : i32
    %87 = arith.muli %c1_i32, %c8_i32_34 : i32
    %88 = tpu.assume_multiple %87, 8 : i32
    %c7_i32_35 = arith.constant 7 : i32
    %89 = arith.subi %c7_i32_35, %c1_i32 : i32
    %c8_i32_36 = arith.constant 8 : i32
    %90 = arith.muli %89, %c8_i32_36 : i32
    %91 = tpu.assume_multiple %90, 8 : i32
    %92 = arith.index_cast %88 : i32 to index
    %c0_37 = arith.constant 0 : index
    %93 = vector.load %arg13[%92, %c0_37] : memref<64x96xf32, #tpu.memory_space<vmem>>, vector<8x96xf32>
    %94 = arith.index_cast %91 : i32 to index
    %c0_38 = arith.constant 0 : index
    %95 = vector.load %arg14[%94, %c0_38] : memref<64x96xf32, #tpu.memory_space<vmem>>, vector<8x96xf32>
    %cst_39 = arith.constant dense<0.000000e+00> : vector<8x96xf32>
    %96 = tpu.matmul %58, %13, %cst_39 {dimension_numbers = #tpu.dot_dimension_numbers<[1], [0], [0], [1], [0, 0, 1, 1], [], []>} : vector<8x32xf32>, vector<32x96xf32>, vector<8x96xf32> -> vector<8x96xf32>
    %97 = vector.extract_strided_slice %93 {offsets = [0, 0], sizes = [8, 32], strides = [1, 1]} : vector<8x96xf32> to vector<8x32xf32>
    %98 = vector.extract_strided_slice %96 {offsets = [0, 0], sizes = [8, 32], strides = [1, 1]} : vector<8x96xf32> to vector<8x32xf32>
    %99 = arith.addf %97, %98 : vector<8x32xf32>
    %100 = arith.negf %99 : vector<8x32xf32>
    %101 = math.exp %100 : vector<8x32xf32>
    %cst_40 = arith.constant 1.000000e+00 : f32
    %102 = vector.broadcast %cst_40 : f32 to vector<8x32xf32>
    %103 = arith.addf %102, %101 : vector<8x32xf32>
    %104 = arith.divf %102, %103 : vector<8x32xf32>
    %105 = vector.extract_strided_slice %93 {offsets = [0, 32], sizes = [8, 32], strides = [1, 1]} : vector<8x96xf32> to vector<8x32xf32>
    %106 = vector.extract_strided_slice %96 {offsets = [0, 32], sizes = [8, 32], strides = [1, 1]} : vector<8x96xf32> to vector<8x32xf32>
    %107 = arith.addf %105, %106 : vector<8x32xf32>
    %108 = arith.negf %107 : vector<8x32xf32>
    %109 = math.exp %108 : vector<8x32xf32>
    %cst_41 = arith.constant 1.000000e+00 : f32
    %110 = vector.broadcast %cst_41 : f32 to vector<8x32xf32>
    %111 = arith.addf %110, %109 : vector<8x32xf32>
    %112 = arith.divf %110, %111 : vector<8x32xf32>
    %113 = vector.extract_strided_slice %93 {offsets = [0, 64], sizes = [8, 32], strides = [1, 1]} : vector<8x96xf32> to vector<8x32xf32>
    %114 = vector.extract_strided_slice %96 {offsets = [0, 64], sizes = [8, 32], strides = [1, 1]} : vector<8x96xf32> to vector<8x32xf32>
    %115 = arith.addf %114, %17 : vector<8x32xf32>
    %116 = arith.mulf %104, %115 : vector<8x32xf32>
    %117 = arith.addf %113, %116 : vector<8x32xf32>
    %118 = math.tanh %117 : vector<8x32xf32>
    %cst_42 = arith.constant 1.000000e+00 : f32
    %119 = vector.broadcast %cst_42 : f32 to vector<8x32xf32>
    %120 = arith.subf %119, %112 : vector<8x32xf32>
    %121 = arith.mulf %120, %118 : vector<8x32xf32>
    %122 = arith.mulf %112, %58 : vector<8x32xf32>
    %123 = arith.addf %121, %122 : vector<8x32xf32>
    %cst_43 = arith.constant dense<0.000000e+00> : vector<8x96xf32>
    %124 = tpu.matmul %86, %14, %cst_43 {dimension_numbers = #tpu.dot_dimension_numbers<[1], [0], [0], [1], [0, 0, 1, 1], [], []>} : vector<8x32xf32>, vector<32x96xf32>, vector<8x96xf32> -> vector<8x96xf32>
    %125 = vector.extract_strided_slice %95 {offsets = [0, 0], sizes = [8, 32], strides = [1, 1]} : vector<8x96xf32> to vector<8x32xf32>
    %126 = vector.extract_strided_slice %124 {offsets = [0, 0], sizes = [8, 32], strides = [1, 1]} : vector<8x96xf32> to vector<8x32xf32>
    %127 = arith.addf %125, %126 : vector<8x32xf32>
    %128 = arith.negf %127 : vector<8x32xf32>
    %129 = math.exp %128 : vector<8x32xf32>
    %cst_44 = arith.constant 1.000000e+00 : f32
    %130 = vector.broadcast %cst_44 : f32 to vector<8x32xf32>
    %131 = arith.addf %130, %129 : vector<8x32xf32>
    %132 = arith.divf %130, %131 : vector<8x32xf32>
    %133 = vector.extract_strided_slice %95 {offsets = [0, 32], sizes = [8, 32], strides = [1, 1]} : vector<8x96xf32> to vector<8x32xf32>
    %134 = vector.extract_strided_slice %124 {offsets = [0, 32], sizes = [8, 32], strides = [1, 1]} : vector<8x96xf32> to vector<8x32xf32>
    %135 = arith.addf %133, %134 : vector<8x32xf32>
    %136 = arith.negf %135 : vector<8x32xf32>
    %137 = math.exp %136 : vector<8x32xf32>
    %cst_45 = arith.constant 1.000000e+00 : f32
    %138 = vector.broadcast %cst_45 : f32 to vector<8x32xf32>
    %139 = arith.addf %138, %137 : vector<8x32xf32>
    %140 = arith.divf %138, %139 : vector<8x32xf32>
    %141 = vector.extract_strided_slice %95 {offsets = [0, 64], sizes = [8, 32], strides = [1, 1]} : vector<8x96xf32> to vector<8x32xf32>
    %142 = vector.extract_strided_slice %124 {offsets = [0, 64], sizes = [8, 32], strides = [1, 1]} : vector<8x96xf32> to vector<8x32xf32>
    %143 = arith.addf %142, %20 : vector<8x32xf32>
    %144 = arith.mulf %132, %143 : vector<8x32xf32>
    %145 = arith.addf %141, %144 : vector<8x32xf32>
    %146 = math.tanh %145 : vector<8x32xf32>
    %cst_46 = arith.constant 1.000000e+00 : f32
    %147 = vector.broadcast %cst_46 : f32 to vector<8x32xf32>
    %148 = arith.subf %147, %140 : vector<8x32xf32>
    %149 = arith.mulf %148, %146 : vector<8x32xf32>
    %150 = arith.mulf %140, %86 : vector<8x32xf32>
    %151 = arith.addf %149, %150 : vector<8x32xf32>
    %c2_i32 = arith.constant 2 : i32
    %c8_i32_47 = arith.constant 8 : i32
    %152 = arith.muli %c2_i32, %c8_i32_47 : i32
    %153 = tpu.assume_multiple %152, 8 : i32
    %c7_i32_48 = arith.constant 7 : i32
    %154 = arith.subi %c7_i32_48, %c2_i32 : i32
    %c8_i32_49 = arith.constant 8 : i32
    %155 = arith.muli %154, %c8_i32_49 : i32
    %156 = tpu.assume_multiple %155, 8 : i32
    %157 = arith.index_cast %153 : i32 to index
    %c0_50 = arith.constant 0 : index
    %158 = vector.load %arg13[%157, %c0_50] : memref<64x96xf32, #tpu.memory_space<vmem>>, vector<8x96xf32>
    %159 = arith.index_cast %156 : i32 to index
    %c0_51 = arith.constant 0 : index
    %160 = vector.load %arg14[%159, %c0_51] : memref<64x96xf32, #tpu.memory_space<vmem>>, vector<8x96xf32>
    %cst_52 = arith.constant dense<0.000000e+00> : vector<8x96xf32>
    %161 = tpu.matmul %123, %13, %cst_52 {dimension_numbers = #tpu.dot_dimension_numbers<[1], [0], [0], [1], [0, 0, 1, 1], [], []>} : vector<8x32xf32>, vector<32x96xf32>, vector<8x96xf32> -> vector<8x96xf32>
    %162 = vector.extract_strided_slice %158 {offsets = [0, 0], sizes = [8, 32], strides = [1, 1]} : vector<8x96xf32> to vector<8x32xf32>
    %163 = vector.extract_strided_slice %161 {offsets = [0, 0], sizes = [8, 32], strides = [1, 1]} : vector<8x96xf32> to vector<8x32xf32>
    %164 = arith.addf %162, %163 : vector<8x32xf32>
    %165 = arith.negf %164 : vector<8x32xf32>
    %166 = math.exp %165 : vector<8x32xf32>
    %cst_53 = arith.constant 1.000000e+00 : f32
    %167 = vector.broadcast %cst_53 : f32 to vector<8x32xf32>
    %168 = arith.addf %167, %166 : vector<8x32xf32>
    %169 = arith.divf %167, %168 : vector<8x32xf32>
    %170 = vector.extract_strided_slice %158 {offsets = [0, 32], sizes = [8, 32], strides = [1, 1]} : vector<8x96xf32> to vector<8x32xf32>
    %171 = vector.extract_strided_slice %161 {offsets = [0, 32], sizes = [8, 32], strides = [1, 1]} : vector<8x96xf32> to vector<8x32xf32>
    %172 = arith.addf %170, %171 : vector<8x32xf32>
    %173 = arith.negf %172 : vector<8x32xf32>
    %174 = math.exp %173 : vector<8x32xf32>
    %cst_54 = arith.constant 1.000000e+00 : f32
    %175 = vector.broadcast %cst_54 : f32 to vector<8x32xf32>
    %176 = arith.addf %175, %174 : vector<8x32xf32>
    %177 = arith.divf %175, %176 : vector<8x32xf32>
    %178 = vector.extract_strided_slice %158 {offsets = [0, 64], sizes = [8, 32], strides = [1, 1]} : vector<8x96xf32> to vector<8x32xf32>
    %179 = vector.extract_strided_slice %161 {offsets = [0, 64], sizes = [8, 32], strides = [1, 1]} : vector<8x96xf32> to vector<8x32xf32>
    %180 = arith.addf %179, %17 : vector<8x32xf32>
    %181 = arith.mulf %169, %180 : vector<8x32xf32>
    %182 = arith.addf %178, %181 : vector<8x32xf32>
    %183 = math.tanh %182 : vector<8x32xf32>
    %cst_55 = arith.constant 1.000000e+00 : f32
    %184 = vector.broadcast %cst_55 : f32 to vector<8x32xf32>
    %185 = arith.subf %184, %177 : vector<8x32xf32>
    %186 = arith.mulf %185, %183 : vector<8x32xf32>
    %187 = arith.mulf %177, %123 : vector<8x32xf32>
    %188 = arith.addf %186, %187 : vector<8x32xf32>
    %cst_56 = arith.constant dense<0.000000e+00> : vector<8x96xf32>
    %189 = tpu.matmul %151, %14, %cst_56 {dimension_numbers = #tpu.dot_dimension_numbers<[1], [0], [0], [1], [0, 0, 1, 1], [], []>} : vector<8x32xf32>, vector<32x96xf32>, vector<8x96xf32> -> vector<8x96xf32>
    %190 = vector.extract_strided_slice %160 {offsets = [0, 0], sizes = [8, 32], strides = [1, 1]} : vector<8x96xf32> to vector<8x32xf32>
    %191 = vector.extract_strided_slice %189 {offsets = [0, 0], sizes = [8, 32], strides = [1, 1]} : vector<8x96xf32> to vector<8x32xf32>
    %192 = arith.addf %190, %191 : vector<8x32xf32>
    %193 = arith.negf %192 : vector<8x32xf32>
    %194 = math.exp %193 : vector<8x32xf32>
    %cst_57 = arith.constant 1.000000e+00 : f32
    %195 = vector.broadcast %cst_57 : f32 to vector<8x32xf32>
    %196 = arith.addf %195, %194 : vector<8x32xf32>
    %197 = arith.divf %195, %196 : vector<8x32xf32>
    %198 = vector.extract_strided_slice %160 {offsets = [0, 32], sizes = [8, 32], strides = [1, 1]} : vector<8x96xf32> to vector<8x32xf32>
    %199 = vector.extract_strided_slice %189 {offsets = [0, 32], sizes = [8, 32], strides = [1, 1]} : vector<8x96xf32> to vector<8x32xf32>
    %200 = arith.addf %198, %199 : vector<8x32xf32>
    %201 = arith.negf %200 : vector<8x32xf32>
    %202 = math.exp %201 : vector<8x32xf32>
    %cst_58 = arith.constant 1.000000e+00 : f32
    %203 = vector.broadcast %cst_58 : f32 to vector<8x32xf32>
    %204 = arith.addf %203, %202 : vector<8x32xf32>
    %205 = arith.divf %203, %204 : vector<8x32xf32>
    %206 = vector.extract_strided_slice %160 {offsets = [0, 64], sizes = [8, 32], strides = [1, 1]} : vector<8x96xf32> to vector<8x32xf32>
    %207 = vector.extract_strided_slice %189 {offsets = [0, 64], sizes = [8, 32], strides = [1, 1]} : vector<8x96xf32> to vector<8x32xf32>
    %208 = arith.addf %207, %20 : vector<8x32xf32>
    %209 = arith.mulf %197, %208 : vector<8x32xf32>
    %210 = arith.addf %206, %209 : vector<8x32xf32>
    %211 = math.tanh %210 : vector<8x32xf32>
    %cst_59 = arith.constant 1.000000e+00 : f32
    %212 = vector.broadcast %cst_59 : f32 to vector<8x32xf32>
    %213 = arith.subf %212, %205 : vector<8x32xf32>
    %214 = arith.mulf %213, %211 : vector<8x32xf32>
    %215 = arith.mulf %205, %151 : vector<8x32xf32>
    %216 = arith.addf %214, %215 : vector<8x32xf32>
    %c3_i32 = arith.constant 3 : i32
    %c8_i32_60 = arith.constant 8 : i32
    %217 = arith.muli %c3_i32, %c8_i32_60 : i32
    %218 = tpu.assume_multiple %217, 8 : i32
    %c7_i32_61 = arith.constant 7 : i32
    %219 = arith.subi %c7_i32_61, %c3_i32 : i32
    %c8_i32_62 = arith.constant 8 : i32
    %220 = arith.muli %219, %c8_i32_62 : i32
    %221 = tpu.assume_multiple %220, 8 : i32
    %222 = arith.index_cast %218 : i32 to index
    %c0_63 = arith.constant 0 : index
    %223 = vector.load %arg13[%222, %c0_63] : memref<64x96xf32, #tpu.memory_space<vmem>>, vector<8x96xf32>
    %224 = arith.index_cast %221 : i32 to index
    %c0_64 = arith.constant 0 : index
    %225 = vector.load %arg14[%224, %c0_64] : memref<64x96xf32, #tpu.memory_space<vmem>>, vector<8x96xf32>
    %cst_65 = arith.constant dense<0.000000e+00> : vector<8x96xf32>
    %226 = tpu.matmul %188, %13, %cst_65 {dimension_numbers = #tpu.dot_dimension_numbers<[1], [0], [0], [1], [0, 0, 1, 1], [], []>} : vector<8x32xf32>, vector<32x96xf32>, vector<8x96xf32> -> vector<8x96xf32>
    %227 = vector.extract_strided_slice %223 {offsets = [0, 0], sizes = [8, 32], strides = [1, 1]} : vector<8x96xf32> to vector<8x32xf32>
    %228 = vector.extract_strided_slice %226 {offsets = [0, 0], sizes = [8, 32], strides = [1, 1]} : vector<8x96xf32> to vector<8x32xf32>
    %229 = arith.addf %227, %228 : vector<8x32xf32>
    %230 = arith.negf %229 : vector<8x32xf32>
    %231 = math.exp %230 : vector<8x32xf32>
    %cst_66 = arith.constant 1.000000e+00 : f32
    %232 = vector.broadcast %cst_66 : f32 to vector<8x32xf32>
    %233 = arith.addf %232, %231 : vector<8x32xf32>
    %234 = arith.divf %232, %233 : vector<8x32xf32>
    %235 = vector.extract_strided_slice %223 {offsets = [0, 32], sizes = [8, 32], strides = [1, 1]} : vector<8x96xf32> to vector<8x32xf32>
    %236 = vector.extract_strided_slice %226 {offsets = [0, 32], sizes = [8, 32], strides = [1, 1]} : vector<8x96xf32> to vector<8x32xf32>
    %237 = arith.addf %235, %236 : vector<8x32xf32>
    %238 = arith.negf %237 : vector<8x32xf32>
    %239 = math.exp %238 : vector<8x32xf32>
    %cst_67 = arith.constant 1.000000e+00 : f32
    %240 = vector.broadcast %cst_67 : f32 to vector<8x32xf32>
    %241 = arith.addf %240, %239 : vector<8x32xf32>
    %242 = arith.divf %240, %241 : vector<8x32xf32>
    %243 = vector.extract_strided_slice %223 {offsets = [0, 64], sizes = [8, 32], strides = [1, 1]} : vector<8x96xf32> to vector<8x32xf32>
    %244 = vector.extract_strided_slice %226 {offsets = [0, 64], sizes = [8, 32], strides = [1, 1]} : vector<8x96xf32> to vector<8x32xf32>
    %245 = arith.addf %244, %17 : vector<8x32xf32>
    %246 = arith.mulf %234, %245 : vector<8x32xf32>
    %247 = arith.addf %243, %246 : vector<8x32xf32>
    %248 = math.tanh %247 : vector<8x32xf32>
    %cst_68 = arith.constant 1.000000e+00 : f32
    %249 = vector.broadcast %cst_68 : f32 to vector<8x32xf32>
    %250 = arith.subf %249, %242 : vector<8x32xf32>
    %251 = arith.mulf %250, %248 : vector<8x32xf32>
    %252 = arith.mulf %242, %188 : vector<8x32xf32>
    %253 = arith.addf %251, %252 : vector<8x32xf32>
    %cst_69 = arith.constant dense<0.000000e+00> : vector<8x96xf32>
    %254 = tpu.matmul %216, %14, %cst_69 {dimension_numbers = #tpu.dot_dimension_numbers<[1], [0], [0], [1], [0, 0, 1, 1], [], []>} : vector<8x32xf32>, vector<32x96xf32>, vector<8x96xf32> -> vector<8x96xf32>
    %255 = vector.extract_strided_slice %225 {offsets = [0, 0], sizes = [8, 32], strides = [1, 1]} : vector<8x96xf32> to vector<8x32xf32>
    %256 = vector.extract_strided_slice %254 {offsets = [0, 0], sizes = [8, 32], strides = [1, 1]} : vector<8x96xf32> to vector<8x32xf32>
    %257 = arith.addf %255, %256 : vector<8x32xf32>
    %258 = arith.negf %257 : vector<8x32xf32>
    %259 = math.exp %258 : vector<8x32xf32>
    %cst_70 = arith.constant 1.000000e+00 : f32
    %260 = vector.broadcast %cst_70 : f32 to vector<8x32xf32>
    %261 = arith.addf %260, %259 : vector<8x32xf32>
    %262 = arith.divf %260, %261 : vector<8x32xf32>
    %263 = vector.extract_strided_slice %225 {offsets = [0, 32], sizes = [8, 32], strides = [1, 1]} : vector<8x96xf32> to vector<8x32xf32>
    %264 = vector.extract_strided_slice %254 {offsets = [0, 32], sizes = [8, 32], strides = [1, 1]} : vector<8x96xf32> to vector<8x32xf32>
    %265 = arith.addf %263, %264 : vector<8x32xf32>
    %266 = arith.negf %265 : vector<8x32xf32>
    %267 = math.exp %266 : vector<8x32xf32>
    %cst_71 = arith.constant 1.000000e+00 : f32
    %268 = vector.broadcast %cst_71 : f32 to vector<8x32xf32>
    %269 = arith.addf %268, %267 : vector<8x32xf32>
    %270 = arith.divf %268, %269 : vector<8x32xf32>
    %271 = vector.extract_strided_slice %225 {offsets = [0, 64], sizes = [8, 32], strides = [1, 1]} : vector<8x96xf32> to vector<8x32xf32>
    %272 = vector.extract_strided_slice %254 {offsets = [0, 64], sizes = [8, 32], strides = [1, 1]} : vector<8x96xf32> to vector<8x32xf32>
    %273 = arith.addf %272, %20 : vector<8x32xf32>
    %274 = arith.mulf %262, %273 : vector<8x32xf32>
    %275 = arith.addf %271, %274 : vector<8x32xf32>
    %276 = math.tanh %275 : vector<8x32xf32>
    %cst_72 = arith.constant 1.000000e+00 : f32
    %277 = vector.broadcast %cst_72 : f32 to vector<8x32xf32>
    %278 = arith.subf %277, %270 : vector<8x32xf32>
    %279 = arith.mulf %278, %276 : vector<8x32xf32>
    %280 = arith.mulf %270, %216 : vector<8x32xf32>
    %281 = arith.addf %279, %280 : vector<8x32xf32>
    %c4_i32 = arith.constant 4 : i32
    %c8_i32_73 = arith.constant 8 : i32
    %282 = arith.muli %c4_i32, %c8_i32_73 : i32
    %283 = tpu.assume_multiple %282, 8 : i32
    %c7_i32_74 = arith.constant 7 : i32
    %284 = arith.subi %c7_i32_74, %c4_i32 : i32
    %c8_i32_75 = arith.constant 8 : i32
    %285 = arith.muli %284, %c8_i32_75 : i32
    %286 = tpu.assume_multiple %285, 8 : i32
    %287 = arith.index_cast %283 : i32 to index
    %c0_76 = arith.constant 0 : index
    %288 = vector.load %arg13[%287, %c0_76] : memref<64x96xf32, #tpu.memory_space<vmem>>, vector<8x96xf32>
    %289 = arith.index_cast %286 : i32 to index
    %c0_77 = arith.constant 0 : index
    %290 = vector.load %arg14[%289, %c0_77] : memref<64x96xf32, #tpu.memory_space<vmem>>, vector<8x96xf32>
    %cst_78 = arith.constant dense<0.000000e+00> : vector<8x96xf32>
    %291 = tpu.matmul %253, %13, %cst_78 {dimension_numbers = #tpu.dot_dimension_numbers<[1], [0], [0], [1], [0, 0, 1, 1], [], []>} : vector<8x32xf32>, vector<32x96xf32>, vector<8x96xf32> -> vector<8x96xf32>
    %292 = vector.extract_strided_slice %288 {offsets = [0, 0], sizes = [8, 32], strides = [1, 1]} : vector<8x96xf32> to vector<8x32xf32>
    %293 = vector.extract_strided_slice %291 {offsets = [0, 0], sizes = [8, 32], strides = [1, 1]} : vector<8x96xf32> to vector<8x32xf32>
    %294 = arith.addf %292, %293 : vector<8x32xf32>
    %295 = arith.negf %294 : vector<8x32xf32>
    %296 = math.exp %295 : vector<8x32xf32>
    %cst_79 = arith.constant 1.000000e+00 : f32
    %297 = vector.broadcast %cst_79 : f32 to vector<8x32xf32>
    %298 = arith.addf %297, %296 : vector<8x32xf32>
    %299 = arith.divf %297, %298 : vector<8x32xf32>
    %300 = vector.extract_strided_slice %288 {offsets = [0, 32], sizes = [8, 32], strides = [1, 1]} : vector<8x96xf32> to vector<8x32xf32>
    %301 = vector.extract_strided_slice %291 {offsets = [0, 32], sizes = [8, 32], strides = [1, 1]} : vector<8x96xf32> to vector<8x32xf32>
    %302 = arith.addf %300, %301 : vector<8x32xf32>
    %303 = arith.negf %302 : vector<8x32xf32>
    %304 = math.exp %303 : vector<8x32xf32>
    %cst_80 = arith.constant 1.000000e+00 : f32
    %305 = vector.broadcast %cst_80 : f32 to vector<8x32xf32>
    %306 = arith.addf %305, %304 : vector<8x32xf32>
    %307 = arith.divf %305, %306 : vector<8x32xf32>
    %308 = vector.extract_strided_slice %288 {offsets = [0, 64], sizes = [8, 32], strides = [1, 1]} : vector<8x96xf32> to vector<8x32xf32>
    %309 = vector.extract_strided_slice %291 {offsets = [0, 64], sizes = [8, 32], strides = [1, 1]} : vector<8x96xf32> to vector<8x32xf32>
    %310 = arith.addf %309, %17 : vector<8x32xf32>
    %311 = arith.mulf %299, %310 : vector<8x32xf32>
    %312 = arith.addf %308, %311 : vector<8x32xf32>
    %313 = math.tanh %312 : vector<8x32xf32>
    %cst_81 = arith.constant 1.000000e+00 : f32
    %314 = vector.broadcast %cst_81 : f32 to vector<8x32xf32>
    %315 = arith.subf %314, %307 : vector<8x32xf32>
    %316 = arith.mulf %315, %313 : vector<8x32xf32>
    %317 = arith.mulf %307, %253 : vector<8x32xf32>
    %318 = arith.addf %316, %317 : vector<8x32xf32>
    %cst_82 = arith.constant dense<0.000000e+00> : vector<8x96xf32>
    %319 = tpu.matmul %281, %14, %cst_82 {dimension_numbers = #tpu.dot_dimension_numbers<[1], [0], [0], [1], [0, 0, 1, 1], [], []>} : vector<8x32xf32>, vector<32x96xf32>, vector<8x96xf32> -> vector<8x96xf32>
    %320 = vector.extract_strided_slice %290 {offsets = [0, 0], sizes = [8, 32], strides = [1, 1]} : vector<8x96xf32> to vector<8x32xf32>
    %321 = vector.extract_strided_slice %319 {offsets = [0, 0], sizes = [8, 32], strides = [1, 1]} : vector<8x96xf32> to vector<8x32xf32>
    %322 = arith.addf %320, %321 : vector<8x32xf32>
    %323 = arith.negf %322 : vector<8x32xf32>
    %324 = math.exp %323 : vector<8x32xf32>
    %cst_83 = arith.constant 1.000000e+00 : f32
    %325 = vector.broadcast %cst_83 : f32 to vector<8x32xf32>
    %326 = arith.addf %325, %324 : vector<8x32xf32>
    %327 = arith.divf %325, %326 : vector<8x32xf32>
    %328 = vector.extract_strided_slice %290 {offsets = [0, 32], sizes = [8, 32], strides = [1, 1]} : vector<8x96xf32> to vector<8x32xf32>
    %329 = vector.extract_strided_slice %319 {offsets = [0, 32], sizes = [8, 32], strides = [1, 1]} : vector<8x96xf32> to vector<8x32xf32>
    %330 = arith.addf %328, %329 : vector<8x32xf32>
    %331 = arith.negf %330 : vector<8x32xf32>
    %332 = math.exp %331 : vector<8x32xf32>
    %cst_84 = arith.constant 1.000000e+00 : f32
    %333 = vector.broadcast %cst_84 : f32 to vector<8x32xf32>
    %334 = arith.addf %333, %332 : vector<8x32xf32>
    %335 = arith.divf %333, %334 : vector<8x32xf32>
    %336 = vector.extract_strided_slice %290 {offsets = [0, 64], sizes = [8, 32], strides = [1, 1]} : vector<8x96xf32> to vector<8x32xf32>
    %337 = vector.extract_strided_slice %319 {offsets = [0, 64], sizes = [8, 32], strides = [1, 1]} : vector<8x96xf32> to vector<8x32xf32>
    %338 = arith.addf %337, %20 : vector<8x32xf32>
    %339 = arith.mulf %327, %338 : vector<8x32xf32>
    %340 = arith.addf %336, %339 : vector<8x32xf32>
    %341 = math.tanh %340 : vector<8x32xf32>
    %cst_85 = arith.constant 1.000000e+00 : f32
    %342 = vector.broadcast %cst_85 : f32 to vector<8x32xf32>
    %343 = arith.subf %342, %335 : vector<8x32xf32>
    %344 = arith.mulf %343, %341 : vector<8x32xf32>
    %345 = arith.mulf %335, %281 : vector<8x32xf32>
    %346 = arith.addf %344, %345 : vector<8x32xf32>
    %c5_i32 = arith.constant 5 : i32
    %c8_i32_86 = arith.constant 8 : i32
    %347 = arith.muli %c5_i32, %c8_i32_86 : i32
    %348 = tpu.assume_multiple %347, 8 : i32
    %c7_i32_87 = arith.constant 7 : i32
    %349 = arith.subi %c7_i32_87, %c5_i32 : i32
    %c8_i32_88 = arith.constant 8 : i32
    %350 = arith.muli %349, %c8_i32_88 : i32
    %351 = tpu.assume_multiple %350, 8 : i32
    %352 = arith.index_cast %348 : i32 to index
    %c0_89 = arith.constant 0 : index
    %353 = vector.load %arg13[%352, %c0_89] : memref<64x96xf32, #tpu.memory_space<vmem>>, vector<8x96xf32>
    %354 = arith.index_cast %351 : i32 to index
    %c0_90 = arith.constant 0 : index
    %355 = vector.load %arg14[%354, %c0_90] : memref<64x96xf32, #tpu.memory_space<vmem>>, vector<8x96xf32>
    %cst_91 = arith.constant dense<0.000000e+00> : vector<8x96xf32>
    %356 = tpu.matmul %318, %13, %cst_91 {dimension_numbers = #tpu.dot_dimension_numbers<[1], [0], [0], [1], [0, 0, 1, 1], [], []>} : vector<8x32xf32>, vector<32x96xf32>, vector<8x96xf32> -> vector<8x96xf32>
    %357 = vector.extract_strided_slice %353 {offsets = [0, 0], sizes = [8, 32], strides = [1, 1]} : vector<8x96xf32> to vector<8x32xf32>
    %358 = vector.extract_strided_slice %356 {offsets = [0, 0], sizes = [8, 32], strides = [1, 1]} : vector<8x96xf32> to vector<8x32xf32>
    %359 = arith.addf %357, %358 : vector<8x32xf32>
    %360 = arith.negf %359 : vector<8x32xf32>
    %361 = math.exp %360 : vector<8x32xf32>
    %cst_92 = arith.constant 1.000000e+00 : f32
    %362 = vector.broadcast %cst_92 : f32 to vector<8x32xf32>
    %363 = arith.addf %362, %361 : vector<8x32xf32>
    %364 = arith.divf %362, %363 : vector<8x32xf32>
    %365 = vector.extract_strided_slice %353 {offsets = [0, 32], sizes = [8, 32], strides = [1, 1]} : vector<8x96xf32> to vector<8x32xf32>
    %366 = vector.extract_strided_slice %356 {offsets = [0, 32], sizes = [8, 32], strides = [1, 1]} : vector<8x96xf32> to vector<8x32xf32>
    %367 = arith.addf %365, %366 : vector<8x32xf32>
    %368 = arith.negf %367 : vector<8x32xf32>
    %369 = math.exp %368 : vector<8x32xf32>
    %cst_93 = arith.constant 1.000000e+00 : f32
    %370 = vector.broadcast %cst_93 : f32 to vector<8x32xf32>
    %371 = arith.addf %370, %369 : vector<8x32xf32>
    %372 = arith.divf %370, %371 : vector<8x32xf32>
    %373 = vector.extract_strided_slice %353 {offsets = [0, 64], sizes = [8, 32], strides = [1, 1]} : vector<8x96xf32> to vector<8x32xf32>
    %374 = vector.extract_strided_slice %356 {offsets = [0, 64], sizes = [8, 32], strides = [1, 1]} : vector<8x96xf32> to vector<8x32xf32>
    %375 = arith.addf %374, %17 : vector<8x32xf32>
    %376 = arith.mulf %364, %375 : vector<8x32xf32>
    %377 = arith.addf %373, %376 : vector<8x32xf32>
    %378 = math.tanh %377 : vector<8x32xf32>
    %cst_94 = arith.constant 1.000000e+00 : f32
    %379 = vector.broadcast %cst_94 : f32 to vector<8x32xf32>
    %380 = arith.subf %379, %372 : vector<8x32xf32>
    %381 = arith.mulf %380, %378 : vector<8x32xf32>
    %382 = arith.mulf %372, %318 : vector<8x32xf32>
    %383 = arith.addf %381, %382 : vector<8x32xf32>
    %cst_95 = arith.constant dense<0.000000e+00> : vector<8x96xf32>
    %384 = tpu.matmul %346, %14, %cst_95 {dimension_numbers = #tpu.dot_dimension_numbers<[1], [0], [0], [1], [0, 0, 1, 1], [], []>} : vector<8x32xf32>, vector<32x96xf32>, vector<8x96xf32> -> vector<8x96xf32>
    %385 = vector.extract_strided_slice %355 {offsets = [0, 0], sizes = [8, 32], strides = [1, 1]} : vector<8x96xf32> to vector<8x32xf32>
    %386 = vector.extract_strided_slice %384 {offsets = [0, 0], sizes = [8, 32], strides = [1, 1]} : vector<8x96xf32> to vector<8x32xf32>
    %387 = arith.addf %385, %386 : vector<8x32xf32>
    %388 = arith.negf %387 : vector<8x32xf32>
    %389 = math.exp %388 : vector<8x32xf32>
    %cst_96 = arith.constant 1.000000e+00 : f32
    %390 = vector.broadcast %cst_96 : f32 to vector<8x32xf32>
    %391 = arith.addf %390, %389 : vector<8x32xf32>
    %392 = arith.divf %390, %391 : vector<8x32xf32>
    %393 = vector.extract_strided_slice %355 {offsets = [0, 32], sizes = [8, 32], strides = [1, 1]} : vector<8x96xf32> to vector<8x32xf32>
    %394 = vector.extract_strided_slice %384 {offsets = [0, 32], sizes = [8, 32], strides = [1, 1]} : vector<8x96xf32> to vector<8x32xf32>
    %395 = arith.addf %393, %394 : vector<8x32xf32>
    %396 = arith.negf %395 : vector<8x32xf32>
    %397 = math.exp %396 : vector<8x32xf32>
    %cst_97 = arith.constant 1.000000e+00 : f32
    %398 = vector.broadcast %cst_97 : f32 to vector<8x32xf32>
    %399 = arith.addf %398, %397 : vector<8x32xf32>
    %400 = arith.divf %398, %399 : vector<8x32xf32>
    %401 = vector.extract_strided_slice %355 {offsets = [0, 64], sizes = [8, 32], strides = [1, 1]} : vector<8x96xf32> to vector<8x32xf32>
    %402 = vector.extract_strided_slice %384 {offsets = [0, 64], sizes = [8, 32], strides = [1, 1]} : vector<8x96xf32> to vector<8x32xf32>
    %403 = arith.addf %402, %20 : vector<8x32xf32>
    %404 = arith.mulf %392, %403 : vector<8x32xf32>
    %405 = arith.addf %401, %404 : vector<8x32xf32>
    %406 = math.tanh %405 : vector<8x32xf32>
    %cst_98 = arith.constant 1.000000e+00 : f32
    %407 = vector.broadcast %cst_98 : f32 to vector<8x32xf32>
    %408 = arith.subf %407, %400 : vector<8x32xf32>
    %409 = arith.mulf %408, %406 : vector<8x32xf32>
    %410 = arith.mulf %400, %346 : vector<8x32xf32>
    %411 = arith.addf %409, %410 : vector<8x32xf32>
    %c6_i32 = arith.constant 6 : i32
    %c8_i32_99 = arith.constant 8 : i32
    %412 = arith.muli %c6_i32, %c8_i32_99 : i32
    %413 = tpu.assume_multiple %412, 8 : i32
    %c7_i32_100 = arith.constant 7 : i32
    %414 = arith.subi %c7_i32_100, %c6_i32 : i32
    %c8_i32_101 = arith.constant 8 : i32
    %415 = arith.muli %414, %c8_i32_101 : i32
    %416 = tpu.assume_multiple %415, 8 : i32
    %417 = arith.index_cast %413 : i32 to index
    %c0_102 = arith.constant 0 : index
    %418 = vector.load %arg13[%417, %c0_102] : memref<64x96xf32, #tpu.memory_space<vmem>>, vector<8x96xf32>
    %419 = arith.index_cast %416 : i32 to index
    %c0_103 = arith.constant 0 : index
    %420 = vector.load %arg14[%419, %c0_103] : memref<64x96xf32, #tpu.memory_space<vmem>>, vector<8x96xf32>
    %cst_104 = arith.constant dense<0.000000e+00> : vector<8x96xf32>
    %421 = tpu.matmul %383, %13, %cst_104 {dimension_numbers = #tpu.dot_dimension_numbers<[1], [0], [0], [1], [0, 0, 1, 1], [], []>} : vector<8x32xf32>, vector<32x96xf32>, vector<8x96xf32> -> vector<8x96xf32>
    %422 = vector.extract_strided_slice %418 {offsets = [0, 0], sizes = [8, 32], strides = [1, 1]} : vector<8x96xf32> to vector<8x32xf32>
    %423 = vector.extract_strided_slice %421 {offsets = [0, 0], sizes = [8, 32], strides = [1, 1]} : vector<8x96xf32> to vector<8x32xf32>
    %424 = arith.addf %422, %423 : vector<8x32xf32>
    %425 = arith.negf %424 : vector<8x32xf32>
    %426 = math.exp %425 : vector<8x32xf32>
    %cst_105 = arith.constant 1.000000e+00 : f32
    %427 = vector.broadcast %cst_105 : f32 to vector<8x32xf32>
    %428 = arith.addf %427, %426 : vector<8x32xf32>
    %429 = arith.divf %427, %428 : vector<8x32xf32>
    %430 = vector.extract_strided_slice %418 {offsets = [0, 32], sizes = [8, 32], strides = [1, 1]} : vector<8x96xf32> to vector<8x32xf32>
    %431 = vector.extract_strided_slice %421 {offsets = [0, 32], sizes = [8, 32], strides = [1, 1]} : vector<8x96xf32> to vector<8x32xf32>
    %432 = arith.addf %430, %431 : vector<8x32xf32>
    %433 = arith.negf %432 : vector<8x32xf32>
    %434 = math.exp %433 : vector<8x32xf32>
    %cst_106 = arith.constant 1.000000e+00 : f32
    %435 = vector.broadcast %cst_106 : f32 to vector<8x32xf32>
    %436 = arith.addf %435, %434 : vector<8x32xf32>
    %437 = arith.divf %435, %436 : vector<8x32xf32>
    %438 = vector.extract_strided_slice %418 {offsets = [0, 64], sizes = [8, 32], strides = [1, 1]} : vector<8x96xf32> to vector<8x32xf32>
    %439 = vector.extract_strided_slice %421 {offsets = [0, 64], sizes = [8, 32], strides = [1, 1]} : vector<8x96xf32> to vector<8x32xf32>
    %440 = arith.addf %439, %17 : vector<8x32xf32>
    %441 = arith.mulf %429, %440 : vector<8x32xf32>
    %442 = arith.addf %438, %441 : vector<8x32xf32>
    %443 = math.tanh %442 : vector<8x32xf32>
    %cst_107 = arith.constant 1.000000e+00 : f32
    %444 = vector.broadcast %cst_107 : f32 to vector<8x32xf32>
    %445 = arith.subf %444, %437 : vector<8x32xf32>
    %446 = arith.mulf %445, %443 : vector<8x32xf32>
    %447 = arith.mulf %437, %383 : vector<8x32xf32>
    %448 = arith.addf %446, %447 : vector<8x32xf32>
    %cst_108 = arith.constant dense<0.000000e+00> : vector<8x96xf32>
    %449 = tpu.matmul %411, %14, %cst_108 {dimension_numbers = #tpu.dot_dimension_numbers<[1], [0], [0], [1], [0, 0, 1, 1], [], []>} : vector<8x32xf32>, vector<32x96xf32>, vector<8x96xf32> -> vector<8x96xf32>
    %450 = vector.extract_strided_slice %420 {offsets = [0, 0], sizes = [8, 32], strides = [1, 1]} : vector<8x96xf32> to vector<8x32xf32>
    %451 = vector.extract_strided_slice %449 {offsets = [0, 0], sizes = [8, 32], strides = [1, 1]} : vector<8x96xf32> to vector<8x32xf32>
    %452 = arith.addf %450, %451 : vector<8x32xf32>
    %453 = arith.negf %452 : vector<8x32xf32>
    %454 = math.exp %453 : vector<8x32xf32>
    %cst_109 = arith.constant 1.000000e+00 : f32
    %455 = vector.broadcast %cst_109 : f32 to vector<8x32xf32>
    %456 = arith.addf %455, %454 : vector<8x32xf32>
    %457 = arith.divf %455, %456 : vector<8x32xf32>
    %458 = vector.extract_strided_slice %420 {offsets = [0, 32], sizes = [8, 32], strides = [1, 1]} : vector<8x96xf32> to vector<8x32xf32>
    %459 = vector.extract_strided_slice %449 {offsets = [0, 32], sizes = [8, 32], strides = [1, 1]} : vector<8x96xf32> to vector<8x32xf32>
    %460 = arith.addf %458, %459 : vector<8x32xf32>
    %461 = arith.negf %460 : vector<8x32xf32>
    %462 = math.exp %461 : vector<8x32xf32>
    %cst_110 = arith.constant 1.000000e+00 : f32
    %463 = vector.broadcast %cst_110 : f32 to vector<8x32xf32>
    %464 = arith.addf %463, %462 : vector<8x32xf32>
    %465 = arith.divf %463, %464 : vector<8x32xf32>
    %466 = vector.extract_strided_slice %420 {offsets = [0, 64], sizes = [8, 32], strides = [1, 1]} : vector<8x96xf32> to vector<8x32xf32>
    %467 = vector.extract_strided_slice %449 {offsets = [0, 64], sizes = [8, 32], strides = [1, 1]} : vector<8x96xf32> to vector<8x32xf32>
    %468 = arith.addf %467, %20 : vector<8x32xf32>
    %469 = arith.mulf %457, %468 : vector<8x32xf32>
    %470 = arith.addf %466, %469 : vector<8x32xf32>
    %471 = math.tanh %470 : vector<8x32xf32>
    %cst_111 = arith.constant 1.000000e+00 : f32
    %472 = vector.broadcast %cst_111 : f32 to vector<8x32xf32>
    %473 = arith.subf %472, %465 : vector<8x32xf32>
    %474 = arith.mulf %473, %471 : vector<8x32xf32>
    %475 = arith.mulf %465, %411 : vector<8x32xf32>
    %476 = arith.addf %474, %475 : vector<8x32xf32>
    %c7_i32_112 = arith.constant 7 : i32
    %c8_i32_113 = arith.constant 8 : i32
    %477 = arith.muli %c7_i32_112, %c8_i32_113 : i32
    %478 = tpu.assume_multiple %477, 8 : i32
    %c7_i32_114 = arith.constant 7 : i32
    %479 = arith.subi %c7_i32_114, %c7_i32_112 : i32
    %c8_i32_115 = arith.constant 8 : i32
    %480 = arith.muli %479, %c8_i32_115 : i32
    %481 = tpu.assume_multiple %480, 8 : i32
    %482 = arith.index_cast %478 : i32 to index
    %c0_116 = arith.constant 0 : index
    %483 = vector.load %arg13[%482, %c0_116] : memref<64x96xf32, #tpu.memory_space<vmem>>, vector<8x96xf32>
    %484 = arith.index_cast %481 : i32 to index
    %c0_117 = arith.constant 0 : index
    %485 = vector.load %arg14[%484, %c0_117] : memref<64x96xf32, #tpu.memory_space<vmem>>, vector<8x96xf32>
    %cst_118 = arith.constant dense<0.000000e+00> : vector<8x96xf32>
    %486 = tpu.matmul %448, %13, %cst_118 {dimension_numbers = #tpu.dot_dimension_numbers<[1], [0], [0], [1], [0, 0, 1, 1], [], []>} : vector<8x32xf32>, vector<32x96xf32>, vector<8x96xf32> -> vector<8x96xf32>
    %487 = vector.extract_strided_slice %483 {offsets = [0, 0], sizes = [8, 32], strides = [1, 1]} : vector<8x96xf32> to vector<8x32xf32>
    %488 = vector.extract_strided_slice %486 {offsets = [0, 0], sizes = [8, 32], strides = [1, 1]} : vector<8x96xf32> to vector<8x32xf32>
    %489 = arith.addf %487, %488 : vector<8x32xf32>
    %490 = arith.negf %489 : vector<8x32xf32>
    %491 = math.exp %490 : vector<8x32xf32>
    %cst_119 = arith.constant 1.000000e+00 : f32
    %492 = vector.broadcast %cst_119 : f32 to vector<8x32xf32>
    %493 = arith.addf %492, %491 : vector<8x32xf32>
    %494 = arith.divf %492, %493 : vector<8x32xf32>
    %495 = vector.extract_strided_slice %483 {offsets = [0, 32], sizes = [8, 32], strides = [1, 1]} : vector<8x96xf32> to vector<8x32xf32>
    %496 = vector.extract_strided_slice %486 {offsets = [0, 32], sizes = [8, 32], strides = [1, 1]} : vector<8x96xf32> to vector<8x32xf32>
    %497 = arith.addf %495, %496 : vector<8x32xf32>
    %498 = arith.negf %497 : vector<8x32xf32>
    %499 = math.exp %498 : vector<8x32xf32>
    %cst_120 = arith.constant 1.000000e+00 : f32
    %500 = vector.broadcast %cst_120 : f32 to vector<8x32xf32>
    %501 = arith.addf %500, %499 : vector<8x32xf32>
    %502 = arith.divf %500, %501 : vector<8x32xf32>
    %503 = vector.extract_strided_slice %483 {offsets = [0, 64], sizes = [8, 32], strides = [1, 1]} : vector<8x96xf32> to vector<8x32xf32>
    %504 = vector.extract_strided_slice %486 {offsets = [0, 64], sizes = [8, 32], strides = [1, 1]} : vector<8x96xf32> to vector<8x32xf32>
    %505 = arith.addf %504, %17 : vector<8x32xf32>
    %506 = arith.mulf %494, %505 : vector<8x32xf32>
    %507 = arith.addf %503, %506 : vector<8x32xf32>
    %508 = math.tanh %507 : vector<8x32xf32>
    %cst_121 = arith.constant 1.000000e+00 : f32
    %509 = vector.broadcast %cst_121 : f32 to vector<8x32xf32>
    %510 = arith.subf %509, %502 : vector<8x32xf32>
    %511 = arith.mulf %510, %508 : vector<8x32xf32>
    %512 = arith.mulf %502, %448 : vector<8x32xf32>
    %513 = arith.addf %511, %512 : vector<8x32xf32>
    %cst_122 = arith.constant dense<0.000000e+00> : vector<8x96xf32>
    %514 = tpu.matmul %476, %14, %cst_122 {dimension_numbers = #tpu.dot_dimension_numbers<[1], [0], [0], [1], [0, 0, 1, 1], [], []>} : vector<8x32xf32>, vector<32x96xf32>, vector<8x96xf32> -> vector<8x96xf32>
    %515 = vector.extract_strided_slice %485 {offsets = [0, 0], sizes = [8, 32], strides = [1, 1]} : vector<8x96xf32> to vector<8x32xf32>
    %516 = vector.extract_strided_slice %514 {offsets = [0, 0], sizes = [8, 32], strides = [1, 1]} : vector<8x96xf32> to vector<8x32xf32>
    %517 = arith.addf %515, %516 : vector<8x32xf32>
    %518 = arith.negf %517 : vector<8x32xf32>
    %519 = math.exp %518 : vector<8x32xf32>
    %cst_123 = arith.constant 1.000000e+00 : f32
    %520 = vector.broadcast %cst_123 : f32 to vector<8x32xf32>
    %521 = arith.addf %520, %519 : vector<8x32xf32>
    %522 = arith.divf %520, %521 : vector<8x32xf32>
    %523 = vector.extract_strided_slice %485 {offsets = [0, 32], sizes = [8, 32], strides = [1, 1]} : vector<8x96xf32> to vector<8x32xf32>
    %524 = vector.extract_strided_slice %514 {offsets = [0, 32], sizes = [8, 32], strides = [1, 1]} : vector<8x96xf32> to vector<8x32xf32>
    %525 = arith.addf %523, %524 : vector<8x32xf32>
    %526 = arith.negf %525 : vector<8x32xf32>
    %527 = math.exp %526 : vector<8x32xf32>
    %cst_124 = arith.constant 1.000000e+00 : f32
    %528 = vector.broadcast %cst_124 : f32 to vector<8x32xf32>
    %529 = arith.addf %528, %527 : vector<8x32xf32>
    %530 = arith.divf %528, %529 : vector<8x32xf32>
    %531 = vector.extract_strided_slice %485 {offsets = [0, 64], sizes = [8, 32], strides = [1, 1]} : vector<8x96xf32> to vector<8x32xf32>
    %532 = vector.extract_strided_slice %514 {offsets = [0, 64], sizes = [8, 32], strides = [1, 1]} : vector<8x96xf32> to vector<8x32xf32>
    %533 = arith.addf %532, %20 : vector<8x32xf32>
    %534 = arith.mulf %522, %533 : vector<8x32xf32>
    %535 = arith.addf %531, %534 : vector<8x32xf32>
    %536 = math.tanh %535 : vector<8x32xf32>
    %cst_125 = arith.constant 1.000000e+00 : f32
    %537 = vector.broadcast %cst_125 : f32 to vector<8x32xf32>
    %538 = arith.subf %537, %530 : vector<8x32xf32>
    %539 = arith.mulf %538, %536 : vector<8x32xf32>
    %540 = arith.mulf %530, %476 : vector<8x32xf32>
    %541 = arith.addf %539, %540 : vector<8x32xf32>
    %c8_i32_126 = arith.constant 8 : i32
    %542 = tpu.concatenate %513, %541 in 1 : vector<8x32xf32>, vector<8x32xf32> -> vector<8x64xf32>
    %c0_127 = arith.constant 0 : index
    %c0_128 = arith.constant 0 : index
    %543 = vector.load %arg12[%c0_127, %c0_128] : memref<8x64xf32, #tpu.memory_space<vmem>>, vector<8x64xf32>
    tpu.vector_store %arg12[%c0_127, %c0_128], %542 {strides = array<i32>} : memref<8x64xf32, #tpu.memory_space<vmem>>, vector<8x64xf32>,
    %c0_129 = arith.constant 0 : index
    %c0_130 = arith.constant 0 : index
    %544 = vector.load %arg9[%c0_129, %c0_130] : memref<64x4xf32, #tpu.memory_space<vmem>>, vector<64x4xf32>
    %cst_131 = arith.constant dense<0.000000e+00> : vector<8x4xf32>
    %545 = tpu.matmul %542, %544, %cst_131 {dimension_numbers = #tpu.dot_dimension_numbers<[1], [0], [0], [1], [0, 0, 1, 1], [], []>} : vector<8x64xf32>, vector<64x4xf32>, vector<8x4xf32> -> vector<8x4xf32>
    %c0_132 = arith.constant 0 : index
    %c0_133 = arith.constant 0 : index
    %546 = vector.load %arg10[%c0_132, %c0_133] : memref<1x4xf32, #tpu.memory_space<vmem>>, vector<1x4xf32>
    %547 = vector.broadcast %546 : vector<1x4xf32> to vector<8x4xf32>
    %548 = arith.addf %545, %547 : vector<8x4xf32>
    %c0_134 = arith.constant 0 : index
    %c0_135 = arith.constant 0 : index
    %549 = vector.load %arg11[%c0_134, %c0_135] : memref<8x4xf32, #tpu.memory_space<vmem>>, vector<8x4xf32>
    tpu.vector_store %arg11[%c0_134, %c0_135], %548 {strides = array<i32>} : memref<8x4xf32, #tpu.memory_space<vmem>>, vector<8x4xf32>,
    return
  }
}

</mosaic_0001>

<bundles_post_ra>
// kernel: gru_model_forward.1
= control target key start
LH: loop header
LB: loop body
LE: loop exit
PB: predicated region body
PF: predicated region fallthrough
CT: control target
= control target key end

     0   :  { %vm57_vm0 = vcmask 130048   ;;  %v2712_v12 = vmov 0.0|0.0   ;;  %vm2713_vm1 = vmmov 0   ;;  %v2714_v25 = vmov 0.0   ;;  %s3191_s1 = inlined_call_operand.vmem [shape: f32[16,96], index: 1, kind: input, shape index: {}]   ;;  %s3192_s0 = inlined_call_operand.vmem [shape: f32[64,16], index: 0, kind: input, shape index: {}]   ;;  %s3193_s2 = inlined_call_operand.vmem [shape: f32[32,96], index: 2, kind: input, shape index: {}]   ;;  %s3194_s5 = inlined_call_operand.vmem [shape: f32[16,96], index: 5, kind: input, shape index: {}]   ;;  %s3195_s6 = inlined_call_operand.vmem [shape: f32[32,96], index: 6, kind: input, shape index: {}]   ;;  %s3196_s4 = inlined_call_operand.vmem [shape: f32[1,32], index: 4, kind: input, shape index: {}]   ;;  %s3197_s8 = inlined_call_operand.vmem [shape: f32[1,32], index: 8, kind: input, shape index: {}]   ;;  %s3198_s3 = inlined_call_operand.vmem [shape: f32[1,96], index: 3, kind: input, shape index: {}]   ;;  %s3199_s7 = inlined_call_operand.vmem [shape: f32[1,96], index: 7, kind: input, shape index: {}]   ;;  %s3200_s9 = inlined_call_operand.vmem [shape: f32[64,4], index: 9, kind: input, shape index: {}]   ;;  %s3201_s12 = inlined_call_operand.vmem [shape: f32[8,64], index: 12, kind: output, shape index: {1}]   ;;  %s3202_s10 = inlined_call_operand.vmem [shape: f32[1,4], index: 10, kind: input, shape index: {}]   ;;  %s3203_s11 = inlined_call_operand.vmem [shape: f32[8,4], index: 11, kind: output, shape index: {0}]  }
   0x1   :  { %v48_v0 = vld [vmem:[%s3191_s1] sm:$0xff]  ;;  %v49_v1 = vld [vmem:[%s3191_s1 + $0x8] sm:$0xff]  ;;  %v42_v13 = vld [vmem:[%s3192_s0 + $0x10] sm:$0xff]  ;;  %vm187_vm2 = vcmask 785408   ;;  %vm341_vm3 = vcmask 261120   ;;  %vm2005_vm4 = vcmask 523264  }
   0x2   :  { %v40_v2 = vld [vmem:[%s3192_s0] sm:$0xff]  ;;  %v2493_v3 = vpack.c.bf16 %v49_v1, %v48_v0  ;;  %v319_v6 = vld [vmem:[%s3193_s2 + $0x8] sm:$0xff]  ;;  %v320_v15 = vld [vmem:[%s3193_s2 + $0x10] sm:$0xff]  ;;  %vm2095_vm5 = vcmask 31744  }
   0x3   :  { %2270 = vmatprep.mubr.msk.f32.mxu0 %vm57_vm0, %v40_v2  ;;  %v2795_v4 = vld [vmem:[%s3192_s0 + $0x20] sm:$0xff]  ;;  %v41_v7 = vld [vmem:[%s3192_s0 + $0x8] sm:$0xff]  ;;  %v321_v16 = vld [vmem:[%s3193_s2 + $0x18] sm:$0xff] }
   0x4   :  { %2276 = vmatprep.mubr.msk.f32.mxu1 %vm57_vm0, %v2795_v4  ;;  %v318_v5 = vld [vmem:[%s3193_s2] sm:$0xff]  ;;  %2494 = vmatprep.subr.bf16.mxu0 %v2493_v3  ;;  %v45_v8 = vld [vmem:[%s3192_s0 + $0x28] sm:$0xff]  ;;  %v46_v17 = vld [vmem:[%s3192_s0 + $0x30] sm:$0xff]  ;;  %v2842_v20 = vpack.c.bf16 %v321_v16, %v320_v15 }
   0x5   :  { %2609 = vmatprep.subr.bf16.mxu1 %v2493_v3  ;;  %2496 = vmatpush3.bf16.msra.mxu0 %v2493_v3  ;;  %v2811_v9 = vpack.c.bf16 %v319_v6, %v318_v5  ;;  %v196_v10 = vld [vmem:[%s3194_s5] sm:$0xff]  ;;  %v197_v11 = vld [vmem:[%s3194_s5 + $0x8] sm:$0xff]  ;;  %v43_v18 = vld [vmem:[%s3192_s0 + $0x18] sm:$0xff] }
   0x6   :  { %2610 = vmatpush3.bf16.msra.mxu1 %v2493_v3  ;;  %2501 = vmatprep.subr.bf16.mxu0 %v2712_v12  ;;  %v2497_v14 = vpack.c.bf16 %v197_v11, %v196_v10  ;;  %v47_v19 = vld [vmem:[%s3192_s0 + $0x38] sm:$0xff]  ;;  %v322_v21 = vld [vmem:[%s3195_s6] sm:$0xff]  ;;  %v323_v22 = vld [vmem:[%s3195_s6 + $0x8] sm:$0xff] }
   0x7   :  { %v2123_v23 = vld [vmem:[%s3196_s4] ss:$0 sm:$0xff]  ;;  %v2859_v24 = vpack.c.bf16 %v323_v22, %v322_v21  ;;  %v324_v26 = vld [vmem:[%s3195_s6 + $0x10] sm:$0xff]  ;;  %v325_v27 = vld [vmem:[%s3195_s6 + $0x18] sm:$0xff]  ;;  %s2715_s4 = smov 64  }
   0x8   :  { %2271 = vmatmul.mubr.msk.f32.vlgmr.msra.gmra.mrb[0].mxu0 %vm57_vm0, %v41_v7  ;;  %2498 = vmatprep.subr.bf16.mxu1 %v2497_v14  ;;  %v2124_v28 = vld [vmem:[%s3197_s8] ss:$0 sm:$0xff]  ;;  %v2879_v29 = vpack.c.bf16 %v325_v27, %v324_v26 }
   0x9   :  { %2277 = vmatmul.mubr.msk.f32.vlgmr.msra.gmra.mrb[0].mxu1 %vm57_vm0, %v45_v8  ;;  %2503 = vmatpush3.bf16.msra.mxu0 %v2811_v9  ;;  %v2105_v30 = vld [vmem:[%s3198_s3] ss:$0 sm:$0xff] }
   0xa   :  { %2273 = vmatprep.mubr.msk.f32.mxu0 %vm57_vm0, %v42_v13  ;;  %2279 = vmatprep.mubr.msk.f32.mxu1 %vm57_vm0, %v46_v17  ;;  %v2114_v50 = vld [vmem:[%s3199_s7] ss:$0 sm:$0xff]  ;;  %s2716_s7 = smov 96  }
   0xb   :  { %2504 = vmatprep.subr.bf16.mxu0 %v2712_v12  ;;  %2500 = vmatpush3.bf16.msra.mxu1 %v2497_v14 }
   0xc   :  { %2274 = vmatmul.mubr.msk.f32.gmra.mrb[2].mxu0 %vm57_vm0, %v43_v18  ;;  %2507 = vmatprep.subr.bf16.mxu1 %v2712_v12 }
   0xd   :  { %2280 = vmatmul.mubr.msk.f32.gmra.mrb[2].mxu1 %vm57_vm0, %v47_v19  ;;  %2506 = vmatpush3.bf16.msra.mxu0 %v2842_v20 }
   0xe   :  { %2286 = vmatprep.mubr.msk.f32.mxu1 %vm57_vm0, %v40_v2  ;;  %2306 = vmatprep.mubr.msk.f32.mxu0 %vm2713_vm1, %v2714_v25 }
   0xf   :  { %422 = vrot.lane.b32.xlu0 %v2123_v23, %s2715_s4  ;;  %2513 = vmatprep.subr.bf16.mxu0 %v2712_v12 }
  0x10   :  { %2307 = vmatmul.mubr.f32.vlgmr.msra.gmra.mrb[4].mxu0 %v2714_v25 }
  0x11   :  { %2287 = vmatmul.mubr.msk.f32.vlgmr.msra.gmra.mrb[4].mxu1 %vm57_vm0, %v41_v7  ;;  %2515 = vmatpush3.bf16.msra.mxu0 %v2811_v9 }
  0x12   :  { %2289 = vmatprep.mubr.msk.f32.mxu1 %vm57_vm0, %v42_v13  ;;  %2509 = vmatpush3.bf16.msra.mxu1 %v2859_v24 }
  0x13   :  { %2510 = vmatprep.subr.bf16.mxu1 %v2712_v12  ;;  %522 = vrot.lane.b32.xlu0 %v2124_v28, %s2715_s4 }
  0x14   :  { %2516 = vmatprep.subr.bf16.mxu0 %v2712_v12  ;;  %2328 = vmatprep.mubr.msk.f32.mxu0 %vm2713_vm1, %v2714_v25 }
  0x15   :  { %2290 = vmatmul.mubr.msk.f32.gmra.mrb[6].mxu1 %vm57_vm0, %v43_v18  ;;  %2518 = vmatpush3.bf16.msra.mxu0 %v2842_v20 }
  0x16   :  { %2292 = vmatprep.mubr.msk.f32.mxu1 %vm57_vm0, %v2795_v4  ;;  %2512 = vmatpush3.bf16.msra.mxu1 %v2879_v29 }
  0x17   :  { %2519 = vmatprep.subr.bf16.mxu1 %v2712_v12  ;;  %2525 = vmatprep.subr.bf16.mxu0 %v2712_v12 }
  0x19   :  { %2293 = vmatmul.mubr.msk.f32.gmra.mrb[8].mxu1 %vm57_vm0, %v45_v8 }
  0x1a   :  { %2295 = vmatprep.mubr.msk.f32.mxu1 %vm57_vm0, %v46_v17 }
  0x1d   :  { %2296 = vmatmul.mubr.msk.f32.gmra.mrb[10].mxu1 %vm57_vm0, %v47_v19 }
  0x1e   :  { %2317 = vmatprep.mubr.msk.f32.mxu1 %vm2713_vm1, %v2714_v25 }
  0x21   :  { %2318 = vmatmul.mubr.f32.vlgmr.msra.gmra.mrb[12].mxu1 %v2714_v25 }
  0x22   :  { %2521 = vmatpush3.bf16.msra.mxu1 %v2859_v24  ;;  %2339 = vmatprep.mubr.msk.f32.mxu1 %vm2713_vm1, %v2714_v25 }
  0x23   :  { %2522 = vmatprep.subr.bf16.mxu1 %v2712_v12 }
  0x26   :  { %2524 = vmatpush3.bf16.msra.mxu1 %v2879_v29 }
  0x27   :  { %2531 = vmatprep.subr.bf16.mxu1 %v2712_v12 }
  0x81   :  { %v2913_v46 = vpop.permute.xlu0 %422 }
  0x85   :  { %v2930_v4 = vpop.permute.xlu0 %522 }
  0xdb   :  { %v2272_v31 = vpop.f32.mrb[0].mxu0 }
  0xdc   :  { %v2278_v32 = vpop.f32.mrb[0].mxu1  ;;  %v154_v33 = vadd.f32 %v2272_v31, %v2105_v30  ;;  %v148_v34 = vpop.f32.mrb[1].mxu0 }
  0xdd   :  { %v174_v35 = vadd.f32 %v2278_v32, %v2105_v30  ;;  %v168_v36 = vpop.f32.mrb[1].mxu1  ;;  %v149_v37 = vadd.f32 %v2105_v30, %v148_v34 }
  0xde   :  { %v169_v38 = vadd.f32 %v2105_v30, %v168_v36  ;;  %189 = vst.msk [vmem:[#allocation2 + $0x8] sm:$0xff] %vm187_vm2, %v154_v33 }
  0xdf   :  { %193 = vst.msk [vmem:[#allocation2 + $0x28] sm:$0xff] %vm187_vm2, %v174_v35  ;;  %188 = vst.msk [vmem:[#allocation2] sm:$0xff] %vm187_vm2, %v149_v37  ;;  %v2275_v39 = vpop.f32.mrb[2].mxu0 }
  0xe0   :  { %192 = vst.msk [vmem:[#allocation2 + $0x20] sm:$0xff] %vm187_vm2, %v169_v38  ;;  %v2281_v40 = vpop.f32.mrb[2].mxu1  ;;  %v164_v41 = vadd.f32 %v2275_v39, %v2105_v30  ;;  %v158_v42 = vpop.f32.mrb[3].mxu0 }
  0xe1   :  { %v184_v43 = vadd.f32 %v2281_v40, %v2105_v30  ;;  %v178_v44 = vpop.f32.mrb[3].mxu1  ;;  %v159_v45 = vadd.f32 %v2105_v30, %v158_v42 }
  0xe2   :  { %v179_v47 = vadd.f32 %v2105_v30, %v178_v44  ;;  %191 = vst.msk [vmem:[#allocation2 + $0x18] sm:$0xff] %vm187_vm2, %v164_v41 }
  0xe3   :  { %195 = vst.msk [vmem:[#allocation2 + $0x38] sm:$0xff] %vm187_vm2, %v184_v43  ;;  %190 = vst.msk [vmem:[#allocation2 + $0x10] sm:$0xff] %vm187_vm2, %v159_v45  ;;  %v411_v48 = vpop.f32.mrb[4].mxu0 }
  0xe4   :  { %194 = vst.msk [vmem:[#allocation2 + $0x30] sm:$0xff] %vm187_vm2, %v179_v47  ;;  %v2288_v49 = vpop.f32.mrb[4].mxu1  ;;  %v2308_v51 = vpop.f32.mrb[5].mxu0  ;;  %v425_v52 = vadd.f32 %v2913_v46, %v411_v48 }
  0xe5   :  { %v277_v53 = vadd.f32 %v2288_v49, %v2114_v50  ;;  %v271_v54 = vpop.f32.mrb[5].mxu1 }
  0xe6   :  { %v272_v55 = vadd.f32 %v2114_v50, %v271_v54  ;;  %427 = vrot.lane.b32.xlu1 %v425_v52, %s2715_s4  ;;  %v338_v8 = vld [vmem:[#allocation2] sm:$0xff] }
  0xe7   :  { %311 = vst.msk [vmem:[#allocation3 + $0x8] sm:$0xff] %vm187_vm2, %v277_v53  ;;  %v415_v10 = vadd.f32 %v411_v48, %v338_v8 }
  0xe8   :  { %310 = vst.msk [vmem:[#allocation3] sm:$0xff] %vm187_vm2, %v272_v55  ;;  %v2291_v56 = vpop.f32.mrb[6].mxu1  ;;  %v546_v55 = vld [vmem:[#allocation2 + $0x8] sm:$0xff] }
  0xe9   :  { %v287_v57 = vadd.f32 %v2291_v56, %v2114_v50  ;;  %v281_v58 = vpop.f32.mrb[7].mxu1  ;;  %v2125_v11 = vmul.f32 -1.442695, %v415_v10 }
  0xea   :  { %v282_v59 = vadd.f32 %v2114_v50, %v281_v58 }
  0xeb   :  { %313 = vst.msk [vmem:[#allocation3 + $0x18] sm:$0xff] %vm187_vm2, %v287_v57  ;;  %2616 = vpow2.f32 %v2125_v11 }
  0xec   :  { %312 = vst.msk [vmem:[#allocation3 + $0x10] sm:$0xff] %vm187_vm2, %v282_v59  ;;  %v2294_v60 = vpop.f32.mrb[8].mxu1 }
  0xed   :  { %v297_v61 = vadd.f32 %v2294_v60, %v2114_v50  ;;  %v291_v62 = vpop.f32.mrb[9].mxu1 }
  0xee   :  { %v292_v63 = vadd.f32 %v2114_v50, %v291_v62 }
  0xef   :  { %315 = vst.msk [vmem:[#allocation3 + $0x28] sm:$0xff] %vm187_vm2, %v297_v61 }
  0xf0   :  { %314 = vst.msk [vmem:[#allocation3 + $0x20] sm:$0xff] %vm187_vm2, %v292_v63  ;;  %v2297_v0 = vpop.f32.mrb[10].mxu1 }
  0xf1   :  { %v307_v1 = vadd.f32 %v2297_v0, %v2114_v50  ;;  %v301_v2 = vpop.f32.mrb[11].mxu1 }
  0xf2   :  { %v302_v3 = vadd.f32 %v2114_v50, %v301_v2 }
  0xf3   :  { %317 = vst.msk [vmem:[#allocation3 + $0x38] sm:$0xff] %vm187_vm2, %v307_v1 }
  0xf4   :  { %316 = vst.msk [vmem:[#allocation3 + $0x30] sm:$0xff] %vm187_vm2, %v302_v3  ;;  %v511_v5 = vpop.f32.mrb[12].mxu1 }
  0xf5   :  { %v525_v6 = vadd.f32 %v2930_v4, %v511_v5  ;;  %v2319_v7 = vpop.f32.mrb[13].mxu1  ;;  %v2617_v15 = vpop.eup %2616 }
  0xf6   :  { %v419_v17 = vadd.f32 1.0, %v2617_v15 }
  0xf7   :  { %527 = vrot.lane.b32.xlu1 %v525_v6, %s2715_s4 }
  0xfa   :  { %v340_v13 = vld [vmem:[#allocation3 + $0x38] sm:$0xff] }
  0xfb   :  { %v515_v14 = vadd.f32 %v511_v5, %v340_v13  ;;  %v548_v58 = vld [vmem:[#allocation3 + $0x30] sm:$0xff] }
  0xfd   :  { %v2126_v16 = vmul.f32 -1.442695, %v515_v14 }
  0xff   :  { %2618 = vpow2.f32 %v2126_v16 }
 0x100   :  { %2620 = vrcp.f32 %v419_v17 }
 0x109   :  { %v2619_v18 = vpop.eup %2618 }
 0x10a   :  { %v2621_v19 = vpop.eup %2620  ;;  %v519_v21 = vadd.f32 1.0, %v2619_v18 }
 0x10b   :  { %v437_v36 = vsub.f32 1.0, %v2621_v19  ;;  %v443_v38 = vmul.f32 0.0, %v2621_v19 }
 0x10c   :  { %2622 = vrcp.f32 %v519_v21 }
 0x116   :  { %v2623_v26 = vpop.eup %2622 }
 0x117   :  { %v537_v41 = vsub.f32 1.0, %v2623_v26  ;;  %v543_v43 = vmul.f32 0.0, %v2623_v26 }
 0x158   :  { %v428_v22 = vpop.permute.xlu1 %427 }
 0x159   :  { %v430_v23 = vmul.f32 %v2621_v19, %v428_v22 }
 0x15b   :  { %432 = vrot.lane.b32.xlu0 %v430_v23, %s2715_s4 }
 0x169   :  { %v528_v27 = vpop.permute.xlu1 %527 }
 0x16a   :  { %v530_v28 = vmul.f32 %v2623_v26, %v528_v27 }
 0x16c   :  { %532 = vrot.lane.b32.xlu1 %v530_v28, %s2715_s4 }
 0x1cd   :  { %v433_v30 = vpop.permute.xlu0 %432 }
 0x1ce   :  { %v435_v31 = vadd.f32 %v433_v30, %v338_v8 }
 0x1d0   :  { %2624 = vtanh.f32 %v435_v31 }
 0x1da   :  { %v2625_v32 = vpop.eup %2624 }
 0x1db   :  { %439 = vrot.lane.b32.xlu0 %v2625_v32, %s2716_s7 }
 0x1de   :  { %v533_v33 = vpop.permute.xlu1 %532 }
 0x1df   :  { %v535_v34 = vadd.f32 %v533_v33, %v340_v13 }
 0x1e1   :  { %2626 = vtanh.f32 %v535_v34 }
 0x1eb   :  { %v2627_v35 = vpop.eup %2626 }
 0x1ec   :  { %539 = vrot.lane.b32.xlu1 %v2627_v35, %s2716_s7 }
 0x24d   :  { %v440_v37 = vpop.permute.xlu0 %439 }
 0x24e   :  { %v442_v39 = vmul.f32 %v440_v37, %v437_v36 }
 0x250   :  { %v2940_v40 = vadd.f32 %v443_v38, %v442_v39  ;;  %v754_v38 = vld [vmem:[#allocation2 + $0x10] sm:$0xff] }
 0x252   :  { %550 = vrot.lane.b32.xlu0 %v2940_v40, %s2716_s7 }
 0x25e   :  { %v540_v42 = vpop.permute.xlu1 %539 }
 0x25f   :  { %v542_v44 = vmul.f32 %v540_v42, %v537_v41  ;;  %v756_v41 = vld [vmem:[#allocation3 + $0x28] sm:$0xff] }
 0x261   :  { %v2944_v45 = vadd.f32 %v543_v43, %v542_v44 }
 0x263   :  { %652 = vrot.lane.b32.xlu1 %v2944_v45, %s2716_s7 }
 0x2c4   :  { %v551_v47 = vpop.permute.xlu0 %550 }
 0x2c5   :  { %2329 = vmatmul.mubr.msk.f32.vlgmr.msra.gmra.mrb[6].mxu0 %vm341_vm3, %v551_v47 }
 0x2c6   :  { %2527 = vmatpush3.bf16.msra.mxu0 %v2811_v9  ;;  %2350 = vmatprep.mubr.msk.f32.mxu0 %vm2713_vm1, %v2714_v25 }
 0x2c7   :  { %2528 = vmatprep.subr.bf16.mxu0 %v2712_v12 }
 0x2ca   :  { %2530 = vmatpush3.bf16.msra.mxu0 %v2842_v20 }
 0x2cb   :  { %2537 = vmatprep.subr.bf16.mxu0 %v2712_v12 }
 0x2d5   :  { %v653_v48 = vpop.permute.xlu1 %652 }
 0x2d6   :  { %2340 = vmatmul.mubr.msk.f32.vlgmr.msra.gmra.mrb[14].mxu1 %vm341_vm3, %v653_v48 }
 0x2d7   :  { %2533 = vmatpush3.bf16.msra.mxu1 %v2859_v24  ;;  %2361 = vmatprep.mubr.msk.f32.mxu1 %vm2713_vm1, %v2714_v25 }
 0x2d8   :  { %2534 = vmatprep.subr.bf16.mxu1 %v2712_v12 }
 0x2db   :  { %2536 = vmatpush3.bf16.msra.mxu1 %v2879_v29 }
 0x2dc   :  { %2543 = vmatprep.subr.bf16.mxu1 %v2712_v12 }
 0x398   :  { %v620_v49 = vpop.f32.mrb[6].mxu0 }
 0x399   :  { %v631_v50 = vadd.f32 %v620_v49, %v2913_v46  ;;  %v2330_v51 = vpop.f32.mrb[7].mxu0  ;;  %v624_v56 = vadd.f32 %v620_v49, %v546_v55 }
 0x39b   :  { %633 = vrot.lane.b32.xlu0 %v631_v50, %s2715_s4  ;;  %v2128_v57 = vmul.f32 -1.442695, %v624_v56 }
 0x39d   :  { %2628 = vpow2.f32 %v2128_v57 }
 0x3a7   :  { %v2629_v60 = vpop.eup %2628 }
 0x3a8   :  { %v628_v62 = vadd.f32 1.0, %v2629_v60 }
 0x3a9   :  { %v722_v52 = vpop.f32.mrb[14].mxu1 }
 0x3aa   :  { %v733_v53 = vadd.f32 %v722_v52, %v2930_v4  ;;  %v2341_v54 = vpop.f32.mrb[15].mxu1  ;;  %v726_v59 = vadd.f32 %v722_v52, %v548_v58 }
 0x3ac   :  { %735 = vrot.lane.b32.xlu1 %v733_v53, %s2715_s4  ;;  %v2130_v61 = vmul.f32 -1.442695, %v726_v59 }
 0x3ae   :  { %2630 = vpow2.f32 %v2130_v61 }
 0x3af   :  { %2632 = vrcp.f32 %v628_v62 }
 0x3b8   :  { %v2631_v63 = vpop.eup %2630 }
 0x3b9   :  { %v2633_v0 = vpop.eup %2632  ;;  %v730_v3 = vadd.f32 1.0, %v2631_v63 }
 0x3ba   :  { %v643_v16 = vsub.f32 1.0, %v2633_v0  ;;  %v649_v18 = vmul.f32 %v2633_v0, %v2940_v40 }
 0x3bb   :  { %2634 = vrcp.f32 %v730_v3 }
 0x3c5   :  { %v2635_v5 = vpop.eup %2634 }
 0x3c6   :  { %v745_v22 = vsub.f32 1.0, %v2635_v5  ;;  %v751_v26 = vmul.f32 %v2635_v5, %v2944_v45 }
 0x40d   :  { %v634_v1 = vpop.permute.xlu0 %633 }
 0x40e   :  { %v636_v2 = vmul.f32 %v2633_v0, %v634_v1 }
 0x410   :  { %638 = vrot.lane.b32.xlu0 %v636_v2, %s2715_s4 }
 0x41e   :  { %v736_v6 = vpop.permute.xlu1 %735 }
 0x41f   :  { %v738_v7 = vmul.f32 %v2635_v5, %v736_v6 }
 0x421   :  { %740 = vrot.lane.b32.xlu1 %v738_v7, %s2715_s4 }
 0x482   :  { %v639_v8 = vpop.permute.xlu0 %638 }
 0x483   :  { %v641_v10 = vadd.f32 %v639_v8, %v546_v55 }
 0x485   :  { %2636 = vtanh.f32 %v641_v10 }
 0x48f   :  { %v2637_v11 = vpop.eup %2636 }
 0x490   :  { %645 = vrot.lane.b32.xlu0 %v2637_v11, %s2716_s7 }
 0x493   :  { %v741_v13 = vpop.permute.xlu1 %740 }
 0x494   :  { %v743_v14 = vadd.f32 %v741_v13, %v548_v58 }
 0x496   :  { %2638 = vtanh.f32 %v743_v14 }
 0x4a0   :  { %v2639_v15 = vpop.eup %2638 }
 0x4a1   :  { %747 = vrot.lane.b32.xlu1 %v2639_v15, %s2716_s7 }
 0x502   :  { %v646_v17 = vpop.permute.xlu0 %645 }
 0x503   :  { %v648_v19 = vmul.f32 %v646_v17, %v643_v16 }
 0x505   :  { %v2971_v21 = vadd.f32 %v649_v18, %v648_v19  ;;  %v962_v18 = vld [vmem:[#allocation2 + $0x18] sm:$0xff] }
 0x507   :  { %758 = vrot.lane.b32.xlu0 %v2971_v21, %s2716_s7 }
 0x513   :  { %v748_v23 = vpop.permute.xlu1 %747 }
 0x514   :  { %v750_v27 = vmul.f32 %v748_v23, %v745_v22  ;;  %v964_v22 = vld [vmem:[#allocation3 + $0x20] sm:$0xff] }
 0x516   :  { %v2976_v28 = vadd.f32 %v751_v26, %v750_v27 }
 0x518   :  { %860 = vrot.lane.b32.xlu1 %v2976_v28, %s2716_s7 }
 0x579   :  { %v759_v30 = vpop.permute.xlu0 %758 }
 0x57a   :  { %2351 = vmatmul.mubr.msk.f32.vlgmr.msra.gmra.mrb[8].mxu0 %vm341_vm3, %v759_v30 }
 0x57b   :  { %2539 = vmatpush3.bf16.msra.mxu0 %v2811_v9  ;;  %2372 = vmatprep.mubr.msk.f32.mxu0 %vm2713_vm1, %v2714_v25 }
 0x57c   :  { %2540 = vmatprep.subr.bf16.mxu0 %v2712_v12 }
 0x57f   :  { %2542 = vmatpush3.bf16.msra.mxu0 %v2842_v20 }
 0x580   :  { %2549 = vmatprep.subr.bf16.mxu0 %v2712_v12 }
 0x58a   :  { %v861_v31 = vpop.permute.xlu1 %860 }
 0x58b   :  { %2362 = vmatmul.mubr.msk.f32.vlgmr.msra.gmra.mrb[16].mxu1 %vm341_vm3, %v861_v31 }
 0x58c   :  { %2545 = vmatpush3.bf16.msra.mxu1 %v2859_v24  ;;  %2383 = vmatprep.mubr.msk.f32.mxu1 %vm2713_vm1, %v2714_v25 }
 0x58d   :  { %2546 = vmatprep.subr.bf16.mxu1 %v2712_v12 }
 0x590   :  { %2548 = vmatpush3.bf16.msra.mxu1 %v2879_v29 }
 0x591   :  { %2555 = vmatprep.subr.bf16.mxu1 %v2712_v12 }
 0x64d   :  { %v828_v32 = vpop.f32.mrb[8].mxu0 }
 0x64e   :  { %v839_v33 = vadd.f32 %v828_v32, %v2913_v46  ;;  %v2352_v34 = vpop.f32.mrb[9].mxu0  ;;  %v832_v39 = vadd.f32 %v828_v32, %v754_v38 }
 0x650   :  { %841 = vrot.lane.b32.xlu0 %v839_v33, %s2715_s4  ;;  %v2132_v40 = vmul.f32 -1.442695, %v832_v39 }
 0x652   :  { %2640 = vpow2.f32 %v2132_v40 }
 0x65c   :  { %v2641_v43 = vpop.eup %2640 }
 0x65d   :  { %v836_v45 = vadd.f32 1.0, %v2641_v43 }
 0x65e   :  { %v930_v35 = vpop.f32.mrb[16].mxu1 }
 0x65f   :  { %v941_v36 = vadd.f32 %v930_v35, %v2930_v4  ;;  %v2363_v37 = vpop.f32.mrb[17].mxu1  ;;  %v934_v42 = vadd.f32 %v930_v35, %v756_v41 }
 0x661   :  { %943 = vrot.lane.b32.xlu1 %v941_v36, %s2715_s4  ;;  %v2134_v44 = vmul.f32 -1.442695, %v934_v42 }
 0x663   :  { %2642 = vpow2.f32 %v2134_v44 }
 0x664   :  { %2644 = vrcp.f32 %v836_v45 }
 0x66d   :  { %v2643_v47 = vpop.eup %2642 }
 0x66e   :  { %v2645_v48 = vpop.eup %2644  ;;  %v938_v51 = vadd.f32 1.0, %v2643_v47 }
 0x66f   :  { %v851_v61 = vsub.f32 1.0, %v2645_v48  ;;  %v857_v63 = vmul.f32 %v2645_v48, %v2971_v21 }
 0x670   :  { %2646 = vrcp.f32 %v938_v51 }
 0x67a   :  { %v2647_v52 = vpop.eup %2646 }
 0x67b   :  { %v953_v2 = vsub.f32 1.0, %v2647_v52  ;;  %v959_v5 = vmul.f32 %v2647_v52, %v2976_v28 }
 0x6c2   :  { %v842_v49 = vpop.permute.xlu0 %841 }
 0x6c3   :  { %v844_v50 = vmul.f32 %v2645_v48, %v842_v49 }
 0x6c5   :  { %846 = vrot.lane.b32.xlu0 %v844_v50, %s2715_s4 }
 0x6d3   :  { %v944_v53 = vpop.permute.xlu1 %943 }
 0x6d4   :  { %v946_v54 = vmul.f32 %v2647_v52, %v944_v53 }
 0x6d6   :  { %948 = vrot.lane.b32.xlu1 %v946_v54, %s2715_s4 }
 0x737   :  { %v847_v55 = vpop.permute.xlu0 %846 }
 0x738   :  { %v849_v56 = vadd.f32 %v847_v55, %v754_v38 }
 0x73a   :  { %2648 = vtanh.f32 %v849_v56 }
 0x744   :  { %v2649_v57 = vpop.eup %2648 }
 0x745   :  { %853 = vrot.lane.b32.xlu0 %v2649_v57, %s2716_s7 }
 0x748   :  { %v949_v58 = vpop.permute.xlu1 %948 }
 0x749   :  { %v951_v59 = vadd.f32 %v949_v58, %v756_v41 }
 0x74b   :  { %2650 = vtanh.f32 %v951_v59 }
 0x755   :  { %v2651_v60 = vpop.eup %2650 }
 0x756   :  { %955 = vrot.lane.b32.xlu1 %v2651_v60, %s2716_s7 }
 0x7b7   :  { %v854_v62 = vpop.permute.xlu0 %853 }
 0x7b8   :  { %v856_v0 = vmul.f32 %v854_v62, %v851_v61 }
 0x7ba   :  { %v3003_v1 = vadd.f32 %v857_v63, %v856_v0  ;;  %v1170_v63 = vld [vmem:[#allocation2 + $0x20] sm:$0xff] }
 0x7bc   :  { %966 = vrot.lane.b32.xlu0 %v3003_v1, %s2716_s7 }
 0x7c8   :  { %v956_v3 = vpop.permute.xlu1 %955 }
 0x7c9   :  { %v958_v6 = vmul.f32 %v956_v3, %v953_v2  ;;  %v1172_v2 = vld [vmem:[#allocation3 + $0x18] sm:$0xff] }
 0x7cb   :  { %v3008_v7 = vadd.f32 %v959_v5, %v958_v6 }
 0x7cd   :  { %1068 = vrot.lane.b32.xlu1 %v3008_v7, %s2716_s7 }
 0x82e   :  { %v967_v8 = vpop.permute.xlu0 %966 }
 0x82f   :  { %2373 = vmatmul.mubr.msk.f32.vlgmr.msra.gmra.mrb[10].mxu0 %vm341_vm3, %v967_v8 }
 0x830   :  { %2551 = vmatpush3.bf16.msra.mxu0 %v2811_v9  ;;  %2394 = vmatprep.mubr.msk.f32.mxu0 %vm2713_vm1, %v2714_v25 }
 0x831   :  { %2552 = vmatprep.subr.bf16.mxu0 %v2712_v12 }
 0x834   :  { %2554 = vmatpush3.bf16.msra.mxu0 %v2842_v20 }
 0x835   :  { %2561 = vmatprep.subr.bf16.mxu0 %v2712_v12 }
 0x83f   :  { %v1069_v10 = vpop.permute.xlu1 %1068 }
 0x840   :  { %2384 = vmatmul.mubr.msk.f32.vlgmr.msra.gmra.mrb[18].mxu1 %vm341_vm3, %v1069_v10 }
 0x841   :  { %2557 = vmatpush3.bf16.msra.mxu1 %v2859_v24  ;;  %2405 = vmatprep.mubr.msk.f32.mxu1 %vm2713_vm1, %v2714_v25 }
 0x842   :  { %2558 = vmatprep.subr.bf16.mxu1 %v2712_v12 }
 0x845   :  { %2560 = vmatpush3.bf16.msra.mxu1 %v2879_v29 }
 0x846   :  { %2567 = vmatprep.subr.bf16.mxu1 %v2712_v12 }
 0x902   :  { %v1036_v11 = vpop.f32.mrb[10].mxu0 }
 0x903   :  { %v1047_v13 = vadd.f32 %v1036_v11, %v2913_v46  ;;  %v2374_v14 = vpop.f32.mrb[11].mxu0  ;;  %v1040_v19 = vadd.f32 %v1036_v11, %v962_v18 }
 0x905   :  { %1049 = vrot.lane.b32.xlu0 %v1047_v13, %s2715_s4  ;;  %v2136_v21 = vmul.f32 -1.442695, %v1040_v19 }
 0x907   :  { %2652 = vpow2.f32 %v2136_v21 }
 0x911   :  { %v2653_v26 = vpop.eup %2652 }
 0x912   :  { %v1044_v28 = vadd.f32 1.0, %v2653_v26 }
 0x913   :  { %v1138_v15 = vpop.f32.mrb[18].mxu1 }
 0x914   :  { %v1149_v16 = vadd.f32 %v1138_v15, %v2930_v4  ;;  %v2385_v17 = vpop.f32.mrb[19].mxu1  ;;  %v1142_v23 = vadd.f32 %v1138_v15, %v964_v22 }
 0x916   :  { %1151 = vrot.lane.b32.xlu1 %v1149_v16, %s2715_s4  ;;  %v2138_v27 = vmul.f32 -1.442695, %v1142_v23 }
 0x918   :  { %2654 = vpow2.f32 %v2138_v27 }
 0x919   :  { %2656 = vrcp.f32 %v1044_v28 }
 0x922   :  { %v2655_v30 = vpop.eup %2654 }
 0x923   :  { %v2657_v31 = vpop.eup %2656  ;;  %v1146_v34 = vadd.f32 1.0, %v2655_v30 }
 0x924   :  { %v1059_v44 = vsub.f32 1.0, %v2657_v31  ;;  %v1065_v47 = vmul.f32 %v2657_v31, %v3003_v1 }
 0x925   :  { %2658 = vrcp.f32 %v1146_v34 }
 0x92f   :  { %v2659_v35 = vpop.eup %2658 }
 0x930   :  { %v1161_v50 = vsub.f32 1.0, %v2659_v35  ;;  %v1167_v52 = vmul.f32 %v2659_v35, %v3008_v7 }
 0x977   :  { %v1050_v32 = vpop.permute.xlu0 %1049 }
 0x978   :  { %v1052_v33 = vmul.f32 %v2657_v31, %v1050_v32 }
 0x97a   :  { %1054 = vrot.lane.b32.xlu0 %v1052_v33, %s2715_s4 }
 0x988   :  { %v1152_v36 = vpop.permute.xlu1 %1151 }
 0x989   :  { %v1154_v37 = vmul.f32 %v2659_v35, %v1152_v36 }
 0x98b   :  { %1156 = vrot.lane.b32.xlu1 %v1154_v37, %s2715_s4 }
 0x9ec   :  { %v1055_v38 = vpop.permute.xlu0 %1054 }
 0x9ed   :  { %v1057_v39 = vadd.f32 %v1055_v38, %v962_v18 }
 0x9ef   :  { %2660 = vtanh.f32 %v1057_v39 }
 0x9f9   :  { %v2661_v40 = vpop.eup %2660 }
 0x9fa   :  { %1061 = vrot.lane.b32.xlu0 %v2661_v40, %s2716_s7 }
 0x9fd   :  { %v1157_v41 = vpop.permute.xlu1 %1156 }
 0x9fe   :  { %v1159_v42 = vadd.f32 %v1157_v41, %v964_v22 }
 0xa00   :  { %2662 = vtanh.f32 %v1159_v42 }
 0xa0a   :  { %v2663_v43 = vpop.eup %2662 }
 0xa0b   :  { %1163 = vrot.lane.b32.xlu1 %v2663_v43, %s2716_s7 }
 0xa6c   :  { %v1062_v45 = vpop.permute.xlu0 %1061 }
 0xa6d   :  { %v1064_v48 = vmul.f32 %v1062_v45, %v1059_v44 }
 0xa6f   :  { %v3035_v49 = vadd.f32 %v1065_v47, %v1064_v48  ;;  %v1378_v47 = vld [vmem:[#allocation2 + $0x28] sm:$0xff] }
 0xa71   :  { %1174 = vrot.lane.b32.xlu0 %v3035_v49, %s2716_s7 }
 0xa7d   :  { %v1164_v51 = vpop.permute.xlu1 %1163 }
 0xa7e   :  { %v1166_v53 = vmul.f32 %v1164_v51, %v1161_v50  ;;  %v1380_v50 = vld [vmem:[#allocation3 + $0x10] sm:$0xff] }
 0xa80   :  { %v3040_v54 = vadd.f32 %v1167_v52, %v1166_v53 }
 0xa82   :  { %1276 = vrot.lane.b32.xlu1 %v3040_v54, %s2716_s7 }
 0xae3   :  { %v1175_v55 = vpop.permute.xlu0 %1174 }
 0xae4   :  { %2395 = vmatmul.mubr.msk.f32.vlgmr.msra.gmra.mrb[12].mxu0 %vm341_vm3, %v1175_v55 }
 0xae5   :  { %2563 = vmatpush3.bf16.msra.mxu0 %v2811_v9  ;;  %2416 = vmatprep.mubr.msk.f32.mxu0 %vm2713_vm1, %v2714_v25 }
 0xae6   :  { %2564 = vmatprep.subr.bf16.mxu0 %v2712_v12 }
 0xae9   :  { %2566 = vmatpush3.bf16.msra.mxu0 %v2842_v20 }
 0xaea   :  { %2573 = vmatprep.subr.bf16.mxu0 %v2712_v12 }
 0xaf4   :  { %v1277_v56 = vpop.permute.xlu1 %1276 }
 0xaf5   :  { %2406 = vmatmul.mubr.msk.f32.vlgmr.msra.gmra.mrb[20].mxu1 %vm341_vm3, %v1277_v56 }
 0xaf6   :  { %2569 = vmatpush3.bf16.msra.mxu1 %v2859_v24  ;;  %2427 = vmatprep.mubr.msk.f32.mxu1 %vm2713_vm1, %v2714_v25 }
 0xaf7   :  { %2570 = vmatprep.subr.bf16.mxu1 %v2712_v12 }
 0xafa   :  { %2572 = vmatpush3.bf16.msra.mxu1 %v2879_v29 }
 0xafb   :  { %2579 = vmatprep.subr.bf16.mxu1 %v2712_v12 }
 0xbb7   :  { %v1244_v57 = vpop.f32.mrb[12].mxu0 }
 0xbb8   :  { %v1255_v58 = vadd.f32 %v1244_v57, %v2913_v46  ;;  %v2396_v59 = vpop.f32.mrb[13].mxu0  ;;  %v1248_v0 = vadd.f32 %v1244_v57, %v1170_v63 }
 0xbba   :  { %1257 = vrot.lane.b32.xlu0 %v1255_v58, %s2715_s4  ;;  %v2140_v1 = vmul.f32 -1.442695, %v1248_v0 }
 0xbbc   :  { %2664 = vpow2.f32 %v2140_v1 }
 0xbc6   :  { %v2665_v5 = vpop.eup %2664 }
 0xbc7   :  { %v1252_v7 = vadd.f32 1.0, %v2665_v5 }
 0xbc8   :  { %v1346_v60 = vpop.f32.mrb[20].mxu1 }
 0xbc9   :  { %v1357_v61 = vadd.f32 %v1346_v60, %v2930_v4  ;;  %v2407_v62 = vpop.f32.mrb[21].mxu1  ;;  %v1350_v3 = vadd.f32 %v1346_v60, %v1172_v2 }
 0xbcb   :  { %1359 = vrot.lane.b32.xlu1 %v1357_v61, %s2715_s4  ;;  %v2142_v6 = vmul.f32 -1.442695, %v1350_v3 }
 0xbcd   :  { %2666 = vpow2.f32 %v2142_v6 }
 0xbce   :  { %2668 = vrcp.f32 %v1252_v7 }
 0xbd7   :  { %v2667_v8 = vpop.eup %2666 }
 0xbd8   :  { %v2669_v10 = vpop.eup %2668  ;;  %v1354_v14 = vadd.f32 1.0, %v2667_v8 }
 0xbd9   :  { %v1267_v27 = vsub.f32 1.0, %v2669_v10  ;;  %v1273_v30 = vmul.f32 %v2669_v10, %v3035_v49 }
 0xbda   :  { %2670 = vrcp.f32 %v1354_v14 }
 0xbe4   :  { %v2671_v15 = vpop.eup %2670 }
 0xbe5   :  { %v1369_v33 = vsub.f32 1.0, %v2671_v15  ;;  %v1375_v35 = vmul.f32 %v2671_v15, %v3040_v54 }
 0xc2c   :  { %v1258_v11 = vpop.permute.xlu0 %1257 }
 0xc2d   :  { %v1260_v13 = vmul.f32 %v2669_v10, %v1258_v11 }
 0xc2f   :  { %1262 = vrot.lane.b32.xlu0 %v1260_v13, %s2715_s4 }
 0xc3d   :  { %v1360_v16 = vpop.permute.xlu1 %1359 }
 0xc3e   :  { %v1362_v17 = vmul.f32 %v2671_v15, %v1360_v16 }
 0xc40   :  { %1364 = vrot.lane.b32.xlu1 %v1362_v17, %s2715_s4 }
 0xca1   :  { %v1263_v18 = vpop.permute.xlu0 %1262 }
 0xca2   :  { %v1265_v19 = vadd.f32 %v1263_v18, %v1170_v63 }
 0xca4   :  { %2672 = vtanh.f32 %v1265_v19 }
 0xcae   :  { %v2673_v21 = vpop.eup %2672 }
 0xcaf   :  { %1269 = vrot.lane.b32.xlu0 %v2673_v21, %s2716_s7 }
 0xcb2   :  { %v1365_v22 = vpop.permute.xlu1 %1364 }
 0xcb3   :  { %v1367_v23 = vadd.f32 %v1365_v22, %v1172_v2 }
 0xcb5   :  { %2674 = vtanh.f32 %v1367_v23 }
 0xcbf   :  { %v2675_v26 = vpop.eup %2674 }
 0xcc0   :  { %1371 = vrot.lane.b32.xlu1 %v2675_v26, %s2716_s7 }
 0xd21   :  { %v1270_v28 = vpop.permute.xlu0 %1269 }
 0xd22   :  { %v1272_v31 = vmul.f32 %v1270_v28, %v1267_v27 }
 0xd24   :  { %v3067_v32 = vadd.f32 %v1273_v30, %v1272_v31  ;;  %v1588_v30 = vld [vmem:[#allocation3 + $0x8] sm:$0xff] }
 0xd26   :  { %1382 = vrot.lane.b32.xlu0 %v3067_v32, %s2716_s7 }
 0xd32   :  { %v1372_v34 = vpop.permute.xlu1 %1371 }
 0xd33   :  { %v1374_v36 = vmul.f32 %v1372_v34, %v1369_v33 }
 0xd35   :  { %v3072_v37 = vadd.f32 %v1375_v35, %v1374_v36 }
 0xd37   :  { %1484 = vrot.lane.b32.xlu1 %v3072_v37, %s2716_s7 }
 0xd98   :  { %v1383_v38 = vpop.permute.xlu0 %1382 }
 0xd99   :  { %2417 = vmatmul.mubr.msk.f32.vlgmr.msra.gmra.mrb[14].mxu0 %vm341_vm3, %v1383_v38 }
 0xd9a   :  { %2575 = vmatpush3.bf16.msra.mxu0 %v2811_v9  ;;  %2438 = vmatprep.mubr.msk.f32.mxu0 %vm2713_vm1, %v2714_v25 }
 0xd9b   :  { %2576 = vmatprep.subr.bf16.mxu0 %v2712_v12 }
 0xd9e   :  { %2578 = vmatpush3.bf16.msra.mxu0 %v2842_v20 }
 0xd9f   :  { %2585 = vmatprep.subr.bf16.mxu0 %v2712_v12 }
 0xda9   :  { %v1485_v39 = vpop.permute.xlu1 %1484 }
 0xdaa   :  { %2428 = vmatmul.mubr.msk.f32.vlgmr.msra.gmra.mrb[22].mxu1 %vm341_vm3, %v1485_v39 }
 0xdab   :  { %2581 = vmatpush3.bf16.msra.mxu1 %v2859_v24  ;;  %2449 = vmatprep.mubr.msk.f32.mxu1 %vm2713_vm1, %v2714_v25 }
 0xdac   :  { %2582 = vmatprep.subr.bf16.mxu1 %v2712_v12 }
 0xdaf   :  { %2584 = vmatpush3.bf16.msra.mxu1 %v2879_v29 }
 0xdb0   :  { %2591 = vmatprep.subr.bf16.mxu1 %v2712_v12 }
 0xe6c   :  { %v1452_v40 = vpop.f32.mrb[14].mxu0 }
 0xe6d   :  { %v1463_v41 = vadd.f32 %v1452_v40, %v2913_v46  ;;  %v2418_v42 = vpop.f32.mrb[15].mxu0  ;;  %v1456_v48 = vadd.f32 %v1452_v40, %v1378_v47 }
 0xe6f   :  { %1465 = vrot.lane.b32.xlu0 %v1463_v41, %s2715_s4  ;;  %v2144_v49 = vmul.f32 -1.442695, %v1456_v48 }
 0xe71   :  { %2676 = vpow2.f32 %v2144_v49 }
 0xe7b   :  { %v2677_v52 = vpop.eup %2676 }
 0xe7c   :  { %v1460_v54 = vadd.f32 1.0, %v2677_v52 }
 0xe7d   :  { %v1554_v43 = vpop.f32.mrb[22].mxu1 }
 0xe7e   :  { %v1565_v44 = vadd.f32 %v1554_v43, %v2930_v4  ;;  %v2429_v45 = vpop.f32.mrb[23].mxu1  ;;  %v1558_v51 = vadd.f32 %v1554_v43, %v1380_v50 }
 0xe80   :  { %1567 = vrot.lane.b32.xlu1 %v1565_v44, %s2715_s4  ;;  %v2146_v53 = vmul.f32 -1.442695, %v1558_v51 }
 0xe82   :  { %2678 = vpow2.f32 %v2146_v53 }
 0xe83   :  { %2680 = vrcp.f32 %v1460_v54 }
 0xe8c   :  { %v2679_v55 = vpop.eup %2678 }
 0xe8d   :  { %v2681_v56 = vpop.eup %2680  ;;  %v1562_v59 = vadd.f32 1.0, %v2679_v55 }
 0xe8e   :  { %v1475_v6 = vsub.f32 1.0, %v2681_v56  ;;  %v1481_v8 = vmul.f32 %v2681_v56, %v3067_v32 }
 0xe8f   :  { %2682 = vrcp.f32 %v1562_v59 }
 0xe99   :  { %v2683_v60 = vpop.eup %2682 }
 0xe9a   :  { %v1577_v13 = vsub.f32 1.0, %v2683_v60  ;;  %v1583_v15 = vmul.f32 %v2683_v60, %v3072_v37 }
 0xee1   :  { %v1466_v57 = vpop.permute.xlu0 %1465 }
 0xee2   :  { %v1468_v58 = vmul.f32 %v2681_v56, %v1466_v57 }
 0xee4   :  { %1470 = vrot.lane.b32.xlu0 %v1468_v58, %s2715_s4 }
 0xef2   :  { %v1568_v61 = vpop.permute.xlu1 %1567 }
 0xef3   :  { %v1570_v62 = vmul.f32 %v2683_v60, %v1568_v61 }
 0xef5   :  { %1572 = vrot.lane.b32.xlu1 %v1570_v62, %s2715_s4 }
 0xf56   :  { %v1471_v63 = vpop.permute.xlu0 %1470 }
 0xf57   :  { %v1473_v0 = vadd.f32 %v1471_v63, %v1378_v47 }
 0xf59   :  { %2684 = vtanh.f32 %v1473_v0 }
 0xf63   :  { %v2685_v1 = vpop.eup %2684 }
 0xf64   :  { %1477 = vrot.lane.b32.xlu0 %v2685_v1, %s2716_s7 }
 0xf67   :  { %v1573_v2 = vpop.permute.xlu1 %1572 }
 0xf68   :  { %v1575_v3 = vadd.f32 %v1573_v2, %v1380_v50 }
 0xf6a   :  { %2686 = vtanh.f32 %v1575_v3  ;;  %v1794_v3 = vld [vmem:[#allocation2 + $0x38] sm:$0xff] }
 0xf74   :  { %v2687_v5 = vpop.eup %2686 }
 0xf75   :  { %1579 = vrot.lane.b32.xlu1 %v2687_v5, %s2716_s7 }
 0xfd6   :  { %v1478_v7 = vpop.permute.xlu0 %1477 }
 0xfd7   :  { %v1480_v10 = vmul.f32 %v1478_v7, %v1475_v6 }
 0xfd9   :  { %v3099_v11 = vadd.f32 %v1481_v8, %v1480_v10 }
 0xfdb   :  { %1590 = vrot.lane.b32.xlu0 %v3099_v11, %s2716_s7 }
 0xfe7   :  { %v1580_v14 = vpop.permute.xlu1 %1579 }
 0xfe8   :  { %v1582_v16 = vmul.f32 %v1580_v14, %v1577_v13 }
 0xfea   :  { %v3104_v17 = vadd.f32 %v1583_v15, %v1582_v16 }
 0xfec   :  { %1692 = vrot.lane.b32.xlu1 %v3104_v17, %s2716_s7 }
0x104d   :  { %v1591_v18 = vpop.permute.xlu0 %1590 }
0x104e   :  { %2439 = vmatmul.mubr.msk.f32.vlgmr.msra.gmra.mrb[16].mxu0 %vm341_vm3, %v1591_v18 }
0x104f   :  { %2587 = vmatpush3.bf16.msra.mxu0 %v2811_v9  ;;  %2460 = vmatprep.mubr.msk.f32.mxu0 %vm2713_vm1, %v2714_v25 }
0x1050   :  { %2588 = vmatprep.subr.bf16.mxu0 %v2712_v12 }
0x1053   :  { %2590 = vmatpush3.bf16.msra.mxu0 %v2842_v20 }
0x1054   :  { %2597 = vmatprep.subr.bf16.mxu0 %v2712_v12 }
0x105e   :  { %v1693_v19 = vpop.permute.xlu1 %1692 }
0x105f   :  { %2450 = vmatmul.mubr.msk.f32.vlgmr.msra.gmra.mrb[24].mxu1 %vm341_vm3, %v1693_v19 }
0x1060   :  { %2593 = vmatpush3.bf16.msra.mxu1 %v2859_v24  ;;  %2471 = vmatprep.mubr.msk.f32.mxu1 %vm2713_vm1, %v2714_v25  ;;  %v1586_v24 = vld [vmem:[#allocation2 + $0x30] sm:$0xff] }
0x1061   :  { %2594 = vmatprep.subr.bf16.mxu1 %v2712_v12 }
0x1064   :  { %2596 = vmatpush3.bf16.msra.mxu1 %v2879_v29 }
0x1121   :  { %v1660_v9 = vpop.f32.mrb[16].mxu0 }
0x1122   :  { %v1671_v21 = vadd.f32 %v1660_v9, %v2913_v46  ;;  %v2440_v22 = vpop.f32.mrb[17].mxu0  ;;  %v1664_v27 = vadd.f32 %v1660_v9, %v1586_v24 }
0x1124   :  { %1673 = vrot.lane.b32.xlu0 %v1671_v21, %s2715_s4  ;;  %v2148_v28 = vmul.f32 -1.442695, %v1664_v27 }
0x1126   :  { %2688 = vpow2.f32 %v2148_v28  ;;  %v2010_v28 = vld [vmem:[%s3200_s9 + $0x18] sm:$0xff] }
0x1130   :  { %v2689_v32 = vpop.eup %2688 }
0x1131   :  { %v1668_v33 = vadd.f32 1.0, %v2689_v32  ;;  %v2012_v32 = vld [vmem:[%s3200_s9 + $0x28] sm:$0xff] }
0x1132   :  { %v1762_v20 = vpop.f32.mrb[24].mxu1 }
0x1133   :  { %v1773_v23 = vadd.f32 %v1762_v20, %v2930_v4  ;;  %v2451_v26 = vpop.f32.mrb[25].mxu1  ;;  %v1766_v31 = vadd.f32 %v1762_v20, %v1588_v30 }
0x1134   :  { %v2008_v26 = vld [vmem:[%s3200_s9 + $0x8] sm:$0xff] }
0x1135   :  { %1775 = vrot.lane.b32.xlu1 %v1773_v23, %s2715_s4  ;;  %v2150_v29 = vmul.f32 -1.442695, %v1766_v31  ;;  %v2007_v23 = vld [vmem:[%s3200_s9] sm:$0xff] }
0x1136   :  { %v2598_v27 = vpack.c.bf16 %v2008_v26, %v2007_v23  ;;  %v2011_v31 = vld [vmem:[%s3200_s9 + $0x20] sm:$0xff] }
0x1137   :  { %2690 = vpow2.f32 %v2150_v29  ;;  %v2604_v29 = vpack.c.bf16 %v2012_v32, %v2011_v31 }
0x1138   :  { %2692 = vrcp.f32 %v1668_v33  ;;  %v2013_v33 = vld [vmem:[%s3200_s9 + $0x30] sm:$0xff] }
0x1141   :  { %v2691_v34 = vpop.eup %2690 }
0x1142   :  { %v2693_v35 = vpop.eup %2692  ;;  %v1770_v38 = vadd.f32 1.0, %v2691_v34  ;;  %v2014_v34 = vld [vmem:[%s3200_s9 + $0x38] sm:$0xff] }
0x1143   :  { %v1683_v49 = vsub.f32 1.0, %v2693_v35  ;;  %v1689_v51 = vmul.f32 %v2693_v35, %v3099_v11 }
0x1144   :  { %2694 = vrcp.f32 %v1770_v38 }
0x114e   :  { %v2695_v39 = vpop.eup %2694 }
0x114f   :  { %v1785_v54 = vsub.f32 1.0, %v2695_v39  ;;  %v1791_v56 = vmul.f32 %v2695_v39, %v3104_v17 }
0x1196   :  { %v1674_v36 = vpop.permute.xlu0 %1673 }
0x1197   :  { %v1676_v37 = vmul.f32 %v2693_v35, %v1674_v36  ;;  %v2607_v36 = vpack.c.bf16 %v2014_v34, %v2013_v33 }
0x1199   :  { %1678 = vrot.lane.b32.xlu0 %v1676_v37, %s2715_s4 }
0x11a7   :  { %v1776_v40 = vpop.permute.xlu1 %1775 }
0x11a8   :  { %v1778_v41 = vmul.f32 %v2695_v39, %v1776_v40 }
0x11aa   :  { %1780 = vrot.lane.b32.xlu1 %v1778_v41, %s2715_s4 }
0x120b   :  { %v1679_v42 = vpop.permute.xlu0 %1678 }
0x120c   :  { %v1681_v43 = vadd.f32 %v1679_v42, %v1586_v24  ;;  %v2009_v24 = vld [vmem:[%s3200_s9 + $0x10] sm:$0xff] }
0x120e   :  { %2696 = vtanh.f32 %v1681_v43 }
0x1218   :  { %v2697_v44 = vpop.eup %2696 }
0x1219   :  { %1685 = vrot.lane.b32.xlu0 %v2697_v44, %s2716_s7 }
0x121c   :  { %v1781_v45 = vpop.permute.xlu1 %1780 }
0x121d   :  { %v1783_v47 = vadd.f32 %v1781_v45, %v1588_v30  ;;  %v2601_v30 = vpack.c.bf16 %v2010_v28, %v2009_v24 }
0x121f   :  { %2698 = vtanh.f32 %v1783_v47 }
0x1229   :  { %v2699_v48 = vpop.eup %2698 }
0x122a   :  { %1787 = vrot.lane.b32.xlu1 %v2699_v48, %s2716_s7 }
0x128b   :  { %v1686_v50 = vpop.permute.xlu0 %1685 }
0x128c   :  { %v1688_v52 = vmul.f32 %v1686_v50, %v1683_v49 }
0x128e   :  { %v3130_v53 = vadd.f32 %v1689_v51, %v1688_v52 }
0x1290   :  { %1797 = vrot.lane.b32.xlu0 %v3130_v53, %s2716_s7 }
0x129c   :  { %v1788_v55 = vpop.permute.xlu1 %1787 }
0x129d   :  { %v1790_v57 = vmul.f32 %v1788_v55, %v1785_v54 }
0x129f   :  { %v3135_v58 = vadd.f32 %v1791_v56, %v1790_v57 }
0x12a1   :  { %1899 = vrot.lane.b32.xlu1 %v3135_v58, %s2716_s7 }
0x1302   :  { %v1798_v59 = vpop.permute.xlu0 %1797 }
0x1303   :  { %2461 = vmatmul.mubr.msk.f32.vlgmr.msra.gmra.mrb[18].mxu0 %vm341_vm3, %v1798_v59 }
0x1304   :  { %2490 = vmatprep.mubr.msk.f32.mxu0 %vm2713_vm1, %v2714_v25  ;;  %v1795_v25 = vld [vmem:[#allocation3] sm:$0xff]  ;;  %2599 = vmatpush3.bf16.msra.mxu0 %v2598_v27 }
0x1305   :  { %2600 = vmatprep.subr.bf16.mxu0 %v2712_v12 }
0x1308   :  { %2602 = vmatpush3.bf16.msra.mxu0 %v2601_v30 }
0x1309   :  { %2603 = vmatprep.subr.bf16.mxu0 %v2712_v12 }
0x130c   :  { %2605 = vmatpush3.bf16.msra.mxu0 %v2604_v29 }
0x130d   :  { %2606 = vmatprep.subr.bf16.mxu0 %v2712_v12  ;;  %v2155_v12 = vld [vmem:[%s3202_s10] ss:$0 sm:$0xff] }
0x1310   :  { %2608 = vmatpush3.bf16.msra.mxu0 %v2607_v36 }
0x1313   :  { %v1900_v60 = vpop.permute.xlu1 %1899 }
0x1314   :  { %2472 = vmatmul.mubr.msk.f32.vlgmr.msra.gmra.mrb[26].mxu1 %vm341_vm3, %v1900_v60 }
0x13d6   :  { %v1867_v61 = vpop.f32.mrb[18].mxu0 }
0x13d7   :  { %v1878_v62 = vadd.f32 %v1867_v61, %v2913_v46  ;;  %v2462_v63 = vpop.f32.mrb[19].mxu0  ;;  %v1871_v5 = vadd.f32 %v1867_v61, %v1794_v3 }
0x13d9   :  { %1880 = vrot.lane.b32.xlu0 %v1878_v62, %s2715_s4  ;;  %v2152_v6 = vmul.f32 -1.442695, %v1871_v5 }
0x13db   :  { %2700 = vpow2.f32 %v2152_v6 }
0x13e5   :  { %v2701_v8 = vpop.eup %2700 }
0x13e6   :  { %v1875_v11 = vadd.f32 1.0, %v2701_v8 }
0x13e7   :  { %v1969_v0 = vpop.f32.mrb[26].mxu1 }
0x13e8   :  { %v1980_v1 = vadd.f32 %v1969_v0, %v2930_v4  ;;  %v2473_v2 = vpop.f32.mrb[27].mxu1  ;;  %v1973_v7 = vadd.f32 %v1969_v0, %v1795_v25 }
0x13ea   :  { %1982 = vrot.lane.b32.xlu1 %v1980_v1, %s2715_s4  ;;  %v2154_v10 = vmul.f32 -1.442695, %v1973_v7 }
0x13ec   :  { %2702 = vpow2.f32 %v2154_v10 }
0x13ed   :  { %2704 = vrcp.f32 %v1875_v11 }
0x13f6   :  { %v2703_v46 = vpop.eup %2702 }
0x13f7   :  { %v2705_v13 = vpop.eup %2704  ;;  %v1977_v16 = vadd.f32 1.0, %v2703_v46 }
0x13f8   :  { %v1890_v37 = vsub.f32 1.0, %v2705_v13  ;;  %v1896_v39 = vmul.f32 %v2705_v13, %v3130_v53 }
0x13f9   :  { %2706 = vrcp.f32 %v1977_v16 }
0x1403   :  { %v2707_v4 = vpop.eup %2706 }
0x1404   :  { %v1992_v43 = vsub.f32 1.0, %v2707_v4  ;;  %v1998_v45 = vmul.f32 %v2707_v4, %v3135_v58 }
0x144b   :  { %v1881_v14 = vpop.permute.xlu0 %1880 }
0x144c   :  { %v1883_v15 = vmul.f32 %v2705_v13, %v1881_v14 }
0x144e   :  { %1885 = vrot.lane.b32.xlu0 %v1883_v15, %s2715_s4 }
0x145c   :  { %v1983_v17 = vpop.permute.xlu1 %1982 }
0x145d   :  { %v1985_v18 = vmul.f32 %v2707_v4, %v1983_v17 }
0x145f   :  { %1987 = vrot.lane.b32.xlu1 %v1985_v18, %s2715_s4 }
0x14c0   :  { %v1886_v19 = vpop.permute.xlu0 %1885 }
0x14c1   :  { %v1888_v9 = vadd.f32 %v1886_v19, %v1794_v3 }
0x14c3   :  { %2708 = vtanh.f32 %v1888_v9 }
0x14cd   :  { %v2709_v21 = vpop.eup %2708 }
0x14ce   :  { %1892 = vrot.lane.b32.xlu0 %v2709_v21, %s2716_s7 }
0x14d1   :  { %v1988_v22 = vpop.permute.xlu1 %1987 }
0x14d2   :  { %v1990_v20 = vadd.f32 %v1988_v22, %v1795_v25 }
0x14d4   :  { %2710 = vtanh.f32 %v1990_v20 }
0x14de   :  { %v2711_v35 = vpop.eup %2710 }
0x14df   :  { %1994 = vrot.lane.b32.xlu1 %v2711_v35, %s2716_s7 }
0x1540   :  { %v1893_v38 = vpop.permute.xlu0 %1892 }
0x1541   :  { %v1895_v40 = vmul.f32 %v1893_v38, %v1890_v37 }
0x1543   :  { %v1897_v41 = vadd.f32 %v1896_v39, %v1895_v40 }
0x1545   :  { %2001 = vrot.lane.b32.xlu0 %v1897_v41, %s2716_s7 }
0x1551   :  { %v1995_v42 = vpop.permute.xlu1 %1994 }
0x1552   :  { %v1997_v44 = vmul.f32 %v1995_v42, %v1992_v43 }
0x1554   :  { %v1999_v47 = vadd.f32 %v1998_v45, %v1997_v44 }
0x15b7   :  { %v2002_v48 = vpop.permute.xlu0 %2001 }
0x15b8   :  { %v2004_v49 = vsel %vm341_vm3, %v2002_v48, %v1999_v47 }
0x15b9   :  { %2006 = vst.msk [vmem:[%s3201_s12] sm:$0xff] %vm2005_vm4, %v2004_v49  ;;  %2491 = vmatmul.mubr.msk.f32.vlgmr.msra.gmra.mrb[20].mxu0 %vm2005_vm4, %v2004_v49 }
0x168c   :  { %v2091_v50 = vpop.f32.mrb[20].mxu0 }
0x168d   :  { %v2092_v51 = vadd.f32 %v2155_v12, %v2091_v50  ;;  %v2492_v52 = vpop.f32.mrb[21].mxu0 }
0x168f   :  { %2096 = vst.msk [vmem:[%s3203_s11] sm:$0xff] %vm2095_vm5, %v2092_v51 }

</bundles_post_ra>
